<compile_context>
chip_gen: v6e
topology: v6e:2x2x1
jax: 0.10.0
libtpu: 0.0.40
codegen_flags: <defaults>
</compile_context>

<pallas_src>
import jax
import jax.numpy as jnp
from jax import lax
from jax.experimental import pallas as pl
from jax.experimental.pallas import tpu as pltpu

HIGHEST = lax.Precision.HIGHEST


# --------------------------- Pallas kernels ---------------------------------

def _cam_qk_kernel(x_ref, wq_ref, bq_ref, wk_ref, bk_ref, q_ref, k_ref):
    # CAM query/key 1x1-conv+BN projections (C//8 output channels each).
    xb = x_ref[...].astype(jnp.bfloat16)                               # (C, tN)
    q_ref[...] = (jnp.dot(wq_ref[...], xb, preferred_element_type=jnp.float32)
                  + bq_ref[...])
    k_ref[...] = (jnp.dot(wk_ref[...], xb, preferred_element_type=jnp.float32)
                  + bk_ref[...])


def _danet_attn_kernel(x_ref, wq_ref, bq_ref, wk_ref, bk_ref,
                       wvp_ref, bvp_ref, wvc_ref, bvc_ref,
                       qc_ref, kc_ref, o_ref):
    # One (batch, query-tile) grid step: projections computed in-kernel from x
    # (weights resident in VMEM), PAM over a tq-row slab, CAM over all C.
    C, tq = o_ref.shape
    q0 = pl.multiple_of(pl.program_id(1) * tq, tq)

    xb_all = x_ref[...].astype(jnp.bfloat16)               # (C, N) all key/value positions
    xt_f32 = x_ref[:, pl.ds(q0, tq)]                       # (C, tq) residual slice (f32)
    xt = xt_f32.astype(jnp.bfloat16)

    # Folded 1x1 conv + BN projections (gammas pre-folded into the value maps).
    kp = (jnp.dot(wk_ref[...], xb_all, preferred_element_type=jnp.float32)
          + bk_ref[...]).astype(jnp.bfloat16)              # (C8, N)  PAM key
    vp = (jnp.dot(wvp_ref[...], xb_all, preferred_element_type=jnp.float32)
          + bvp_ref[...]).astype(jnp.bfloat16)             # (C, N)   gamma_p * PAM value
    qp = (jnp.dot(wq_ref[...], xt, preferred_element_type=jnp.float32)
          + bq_ref[...]).astype(jnp.bfloat16)              # (C8, tq) PAM query (tile)
    vc = (jnp.dot(wvc_ref[...], xt, preferred_element_type=jnp.float32)
          + bvc_ref[...]).astype(jnp.bfloat16)             # (C, tq)  gamma_c * CAM value (tile)

    # ---------------- PAM: tq query rows x all N keys ------------------------
    energy = lax.dot_general(qp, kp, (((0,), (0,)), ((), ())),
                             preferred_element_type=jnp.float32)        # (tq, N)
    m = jnp.max(energy, axis=-1, keepdims=True)
    pe = jnp.exp(energy - m)                               # unnormalized softmax
    s = jnp.sum(pe, axis=-1, keepdims=True)                # (tq, 1)
    out_p = lax.dot_general(vp, pe.astype(jnp.bfloat16), (((1,), (1,)), ((), ())),
                            preferred_element_type=jnp.float32)         # (C, tq)
    out_p = out_p * jnp.transpose(pl.reciprocal(s, approx=True))        # 1/rowsum, lane-oriented

    # ---------------- CAM: (C, C) channel attention, applied to the tile -----
    qc = qc_ref[...].astype(jnp.bfloat16)                  # (C, N8)  torch .view of C//8 map
    kc = kc_ref[...].astype(jnp.bfloat16)
    ec = lax.dot_general(qc, kc, (((1,), (1,)), ((), ())),
                         preferred_element_type=jnp.float32)            # (C, C)
    ecn = jnp.max(ec, axis=-1, keepdims=True) - ec         # torch: max - energy
    pc = jnp.exp(ecn - jnp.max(ecn, axis=-1, keepdims=True))
    sc = jnp.sum(pc, axis=-1, keepdims=True)               # (C, 1)
    out_c = jnp.dot(pc.astype(jnp.bfloat16), vc,
                    preferred_element_type=jnp.float32)                 # (C, tq)
    out_c = out_c * pl.reciprocal(sc, approx=True)

    # sa_feat + sc_feat = (gp*out_p + x) + (gc*out_c + x); gammas already folded.
    o_ref[...] = out_p + out_c + 2.0 * xt_f32


# --------------------------- wrapper / glue ----------------------------------

def _fold_conv_bn(conv_w, conv_b, bn_w, bn_b, bn_mean, bn_var, eps=1e-5):
    w = conv_w.reshape(conv_w.shape[0], conv_w.shape[1])   # (Cout, Cin, 1, 1) -> (Cout, Cin)
    s = bn_w / jnp.sqrt(bn_var + eps)
    return s[:, None] * w, s * (conv_b - bn_mean) + bn_b


def danet_forward(x, params):
    B, C, H, W = x.shape
    N = H * W
    assert C % 8 == 0, "in_dim must be divisible by 8"
    assert N % 8 == 0, "CAM's .view requires H*W divisible by 8"
    C8 = C // 8
    N8 = N // 8
    tq = 128 if N % 128 == 0 else N                        # lane-dense query/spatial tile

    xf = x.reshape(B, C, N).astype(jnp.float32)

    folded = {k: _fold_conv_bn(*params[k]) for k in
              ("pam_q", "pam_k", "pam_v", "cam_q", "cam_k", "cam_v")}
    gp = params["gamma_pam"].reshape(()).astype(jnp.float32)
    gc = params["gamma_cam"].reshape(()).astype(jnp.float32)

    wq, bq = folded["pam_q"]
    wk, bk = folded["pam_k"]
    wvp, bvp = folded["pam_v"]
    wvc, bvc = folded["cam_v"]
    wcq, bcq = folded["cam_q"]
    wck, bck = folded["cam_k"]
    # Fold the attention gammas into the value projections:
    # gamma * (W x + b) = (gamma W) x + gamma b.
    wvp, bvp = gp * wvp, gp * bvp
    wvc, bvc = gc * wvc, gc * bvc

    bf16 = jnp.bfloat16
    col = lambda v: v[:, None]

    # ---- stage 1: CAM query/key projections (C//8 channels each) ----
    cam_q_map, cam_k_map = pl.pallas_call(
        _cam_qk_kernel,
        out_shape=(jax.ShapeDtypeStruct((B, C8, N), jnp.float32),
                   jax.ShapeDtypeStruct((B, C8, N), jnp.float32)),
        grid_spec=pltpu.PrefetchScalarGridSpec(
            num_scalar_prefetch=0,
            grid=(B, N // tq),
            in_specs=[
                pl.BlockSpec((None, C, tq), lambda b, n: (b, 0, n)),
                pl.BlockSpec((C8, C), lambda b, n: (0, 0)),
                pl.BlockSpec((C8, 1), lambda b, n: (0, 0)),
                pl.BlockSpec((C8, C), lambda b, n: (0, 0)),
                pl.BlockSpec((C8, 1), lambda b, n: (0, 0)),
            ],
            out_specs=[
                pl.BlockSpec((None, C8, tq), lambda b, n: (b, 0, n)),
                pl.BlockSpec((None, C8, tq), lambda b, n: (b, 0, n)),
            ],
        ),
        compiler_params=pltpu.CompilerParams(
            dimension_semantics=("parallel", "parallel")),
    )(xf, wcq.astype(bf16), col(bcq), wck.astype(bf16), col(bck))

    # torch's `.view(B, C, -1)` of the (B, C//8, H, W) maps: one contiguous
    # relayout each, done wrapper-side (cheaper than an in-kernel reshape).
    qc = cam_q_map.reshape(B, C, N8)
    kc = cam_k_map.reshape(B, C, N8)

    # ---- stage 2: fused projections + PAM + CAM + residuals ----
    out = pl.pallas_call(
        _danet_attn_kernel,
        out_shape=jax.ShapeDtypeStruct((B, C, N), jnp.float32),
        grid_spec=pltpu.PrefetchScalarGridSpec(
            num_scalar_prefetch=0,
            grid=(B, N // tq),
            in_specs=[
                pl.BlockSpec((None, C, N), lambda b, q: (b, 0, 0)),    # x (all keys/values)
                pl.BlockSpec((C8, C), lambda b, q: (0, 0)),            # W pam_q
                pl.BlockSpec((C8, 1), lambda b, q: (0, 0)),
                pl.BlockSpec((C8, C), lambda b, q: (0, 0)),            # W pam_k
                pl.BlockSpec((C8, 1), lambda b, q: (0, 0)),
                pl.BlockSpec((C, C), lambda b, q: (0, 0)),             # gamma_p * W pam_v
                pl.BlockSpec((C, 1), lambda b, q: (0, 0)),
                pl.BlockSpec((C, C), lambda b, q: (0, 0)),             # gamma_c * W cam_v
                pl.BlockSpec((C, 1), lambda b, q: (0, 0)),
                pl.BlockSpec((None, C, N8), lambda b, q: (b, 0, 0)),   # CAM query view
                pl.BlockSpec((None, C, N8), lambda b, q: (b, 0, 0)),   # CAM key view
            ],
            out_specs=pl.BlockSpec((None, C, tq), lambda b, q: (b, 0, q)),
        ),
        compiler_params=pltpu.CompilerParams(
            dimension_semantics=("parallel", "parallel")),
    )(xf, wq.astype(bf16), col(bq), wk.astype(bf16), col(bk),
      wvp.astype(bf16), col(bvp), wvc.astype(bf16), col(bvc), qc, kc)

    return out.reshape(B, C, H, W)


# --------------------------- reference & params ------------------------------

def danet_reference(x, params):
    B, C, H, W = x.shape
    N = H * W
    xf = x.reshape(B, C, N).astype(jnp.float32)

    def proj(name):
        w, b = _fold_conv_bn(*params[name])
        return jnp.einsum("oc,bcn->bon", w, xf, precision=HIGHEST) + b[None, :, None]

    qp, kp, vp = proj("pam_q"), proj("pam_k"), proj("pam_v")
    qc, kc, vc = proj("cam_q"), proj("cam_k"), proj("cam_v")

    # PAM
    energy = jnp.einsum("bcn,bcm->bnm", qp, kp, precision=HIGHEST)
    attn_p = jax.nn.softmax(energy, axis=-1)
    out_p = jnp.einsum("bcn,bmn->bcm", vp, attn_p, precision=HIGHEST)
    sa = params["gamma_pam"][0] * out_p + xf

    # CAM (with torch's .view reinterpretation of the C//8-channel maps)
    qcv = qc.reshape(B, C, N // 8)
    kcv = kc.reshape(B, C, N // 8)
    ec = jnp.einsum("bct,bdt->bcd", qcv, kcv, precision=HIGHEST)
    ecn = jnp.max(ec, axis=-1, keepdims=True) - ec
    attn_c = jax.nn.softmax(ecn, axis=-1)
    out_c = jnp.einsum("bcd,bdn->bcn", attn_c, vc, precision=HIGHEST)
    sc = params["gamma_cam"][0] * out_c + xf

    return (sa + sc).reshape(B, C, H, W)


def init_params(key, C):
    C8 = C // 8

    def conv_bn(k, cout, cin):
        ks = jax.random.split(k, 5)
        return (
            0.2 * jax.random.normal(ks[0], (cout, cin, 1, 1), jnp.float32),   # conv weight
            0.05 * jax.random.normal(ks[1], (cout,), jnp.float32),            # conv bias
            1.0 + 0.1 * jax.random.normal(ks[2], (cout,), jnp.float32),       # bn weight
            0.1 * jax.random.normal(ks[3], (cout,), jnp.float32),             # bn bias
            0.05 * jax.random.normal(ks[4], (cout,), jnp.float32),            # running_mean
            jnp.ones((cout,), jnp.float32),                                   # running_var
        )

    keys = jax.random.split(key, 6)
    return {
        "pam_q": conv_bn(keys[0], C8, C),
        "pam_k": conv_bn(keys[1], C8, C),
        "pam_v": conv_bn(keys[2], C, C),
        "cam_q": conv_bn(keys[3], C8, C),
        "cam_k": conv_bn(keys[4], C8, C),
        "cam_v": conv_bn(keys[5], C, C),
        # __init__ uses nn.Parameter(torch.zeros(1)); deterministic nonzero values
        # here so the attention path actually contributes to the output.
        "gamma_pam": jnp.array([0.5], jnp.float32),
        "gamma_cam": jnp.array([-0.3], jnp.float32),
    }


if __name__ == "__main__":
    key = jax.random.PRNGKey(0)
    kx, kp = jax.random.split(key)
    B, C, H, W = 2, 16, 16, 16
    x = jax.random.normal(kx, (B, C, H, W), jnp.float32)
    params = init_params(kp, C)

    out = jax.block_until_ready(jax.jit(danet_forward)(x, params))
    ref = jax.block_until_ready(danet_reference(x, params))

    assert out.shape == (B, C, H, W)
    max_err = float(jnp.max(jnp.abs(out - ref)))
    # bf16 MXU operands vs f32-HIGHEST reference -> loosened tolerance.
    assert jnp.allclose(out, ref, rtol=5e-2, atol=5e-2), f"max abs err = {max_err}"
    print("KERNEL_OK")
</pallas_src>

<mosaic_0001>
module attributes {stable_mosaic.version = 11 : i64} {
  func.func @_cam_qk_kernel(%arg0: i32, %arg1: i32, %arg2: memref<1x16x128xf32, #tpu.memory_space<vmem>>, %arg3: memref<2x16xbf16, #tpu.memory_space<vmem>>, %arg4: memref<2x1xf32, #tpu.memory_space<vmem>>, %arg5: memref<2x16xbf16, #tpu.memory_space<vmem>>, %arg6: memref<2x1xf32, #tpu.memory_space<vmem>>, %arg7: memref<1x2x128xf32, #tpu.memory_space<vmem>>, %arg8: memref<1x2x128xf32, #tpu.memory_space<vmem>>) attributes {dimension_semantics = [#tpu.dimension_semantics<parallel>, #tpu.dimension_semantics<parallel>], iteration_bounds = array<i64: 2, 2>, scalar_prefetch = 0 : i64, scratch_operands = 0 : i64, tpu.core_type = #tpu.core_type<tc>, window_params = [{transform_indices = @transform_0, window_bounds = array<i64: 1, 16, 128>}, {pipeline_mode = #tpu.pipeline_mode<synchronous>, transform_indices = @transform_1, window_bounds = array<i64: 2, 16>}, {pipeline_mode = #tpu.pipeline_mode<synchronous>, transform_indices = @transform_2, window_bounds = array<i64: 2, 1>}, {pipeline_mode = #tpu.pipeline_mode<synchronous>, transform_indices = @transform_3, window_bounds = array<i64: 2, 16>}, {pipeline_mode = #tpu.pipeline_mode<synchronous>, transform_indices = @transform_4, window_bounds = array<i64: 2, 1>}, {transform_indices = @transform_5, window_bounds = array<i64: 1, 2, 128>}, {transform_indices = @transform_6, window_bounds = array<i64: 1, 2, 128>}]} {
    %c0 = arith.constant 0 : index
    %c0_0 = arith.constant 0 : index
    %c0_1 = arith.constant 0 : index
    %0 = vector.load %arg2[%c0, %c0_0, %c0_1] : memref<1x16x128xf32, #tpu.memory_space<vmem>>, vector<1x16x128xf32>
    %1 = vector.shape_cast %0 : vector<1x16x128xf32> to vector<16x128xf32>
    %2 = arith.truncf %1 : vector<16x128xf32> to vector<16x128xbf16>
    %c0_2 = arith.constant 0 : index
    %c0_3 = arith.constant 0 : index
    %3 = vector.load %arg3[%c0_2, %c0_3] : memref<2x16xbf16, #tpu.memory_space<vmem>>, vector<2x16xbf16>
    %cst = arith.constant dense<0.000000e+00> : vector<2x128xf32>
    %4 = tpu.matmul %3, %2, %cst {dimension_numbers = #tpu.dot_dimension_numbers<[1], [0], [0], [1], [0, 0, 1, 1], [], []>} : vector<2x16xbf16>, vector<16x128xbf16>, vector<2x128xf32> -> vector<2x128xf32>
    %c0_4 = arith.constant 0 : index
    %c0_5 = arith.constant 0 : index
    %5 = vector.load %arg4[%c0_4, %c0_5] : memref<2x1xf32, #tpu.memory_space<vmem>>, vector<2x1xf32>
    %6 = vector.broadcast %5 : vector<2x1xf32> to vector<2x128xf32>
    %7 = arith.addf %4, %6 : vector<2x128xf32>
    %c0_6 = arith.constant 0 : index
    %c0_7 = arith.constant 0 : index
    %c0_8 = arith.constant 0 : index
    %8 = vector.load %arg7[%c0_6, %c0_7, %c0_8] : memref<1x2x128xf32, #tpu.memory_space<vmem>>, vector<1x2x128xf32>
    %9 = vector.shape_cast %8 : vector<1x2x128xf32> to vector<2x128xf32>
    %10 = vector.shape_cast %7 : vector<2x128xf32> to vector<1x2x128xf32>
    tpu.vector_store %arg7[%c0_6, %c0_7, %c0_8], %10 {strides = array<i32>} : memref<1x2x128xf32, #tpu.memory_space<vmem>>, vector<1x2x128xf32>,
    %c0_9 = arith.constant 0 : index
    %c0_10 = arith.constant 0 : index
    %11 = vector.load %arg5[%c0_9, %c0_10] : memref<2x16xbf16, #tpu.memory_space<vmem>>, vector<2x16xbf16>
    %cst_11 = arith.constant dense<0.000000e+00> : vector<2x128xf32>
    %12 = tpu.matmul %11, %2, %cst_11 {dimension_numbers = #tpu.dot_dimension_numbers<[1], [0], [0], [1], [0, 0, 1, 1], [], []>} : vector<2x16xbf16>, vector<16x128xbf16>, vector<2x128xf32> -> vector<2x128xf32>
    %c0_12 = arith.constant 0 : index
    %c0_13 = arith.constant 0 : index
    %13 = vector.load %arg6[%c0_12, %c0_13] : memref<2x1xf32, #tpu.memory_space<vmem>>, vector<2x1xf32>
    %14 = vector.broadcast %13 : vector<2x1xf32> to vector<2x128xf32>
    %15 = arith.addf %12, %14 : vector<2x128xf32>
    %c0_14 = arith.constant 0 : index
    %c0_15 = arith.constant 0 : index
    %c0_16 = arith.constant 0 : index
    %16 = vector.load %arg8[%c0_14, %c0_15, %c0_16] : memref<1x2x128xf32, #tpu.memory_space<vmem>>, vector<1x2x128xf32>
    %17 = vector.shape_cast %16 : vector<1x2x128xf32> to vector<2x128xf32>
    %18 = vector.shape_cast %15 : vector<2x128xf32> to vector<1x2x128xf32>
    tpu.vector_store %arg8[%c0_14, %c0_15, %c0_16], %18 {strides = array<i32>} : memref<1x2x128xf32, #tpu.memory_space<vmem>>, vector<1x2x128xf32>,
    return
  }
  func.func @transform_0(%arg0: i32, %arg1: i32) -> (i32, i32, i32) {
    %c0_i32 = arith.constant 0 : i32
    %c0_i32_0 = arith.constant 0 : i32
    return %arg0, %c0_i32, %arg1 : i32, i32, i32
  }
  func.func @transform_1(%arg0: i32, %arg1: i32) -> (i32, i32) {
    %c0_i32 = arith.constant 0 : i32
    %c0_i32_0 = arith.constant 0 : i32
    %c0_i32_1 = arith.constant 0 : i32
    return %c0_i32, %c0_i32_0 : i32, i32
  }
  func.func @transform_2(%arg0: i32, %arg1: i32) -> (i32, i32) {
    %c0_i32 = arith.constant 0 : i32
    %c0_i32_0 = arith.constant 0 : i32
    %c0_i32_1 = arith.constant 0 : i32
    return %c0_i32, %c0_i32_0 : i32, i32
  }
  func.func @transform_3(%arg0: i32, %arg1: i32) -> (i32, i32) {
    %c0_i32 = arith.constant 0 : i32
    %c0_i32_0 = arith.constant 0 : i32
    %c0_i32_1 = arith.constant 0 : i32
    return %c0_i32, %c0_i32_0 : i32, i32
  }
  func.func @transform_4(%arg0: i32, %arg1: i32) -> (i32, i32) {
    %c0_i32 = arith.constant 0 : i32
    %c0_i32_0 = arith.constant 0 : i32
    %c0_i32_1 = arith.constant 0 : i32
    return %c0_i32, %c0_i32_0 : i32, i32
  }
  func.func @transform_5(%arg0: i32, %arg1: i32) -> (i32, i32, i32) {
    %c0_i32 = arith.constant 0 : i32
    %c0_i32_0 = arith.constant 0 : i32
    return %arg0, %c0_i32, %arg1 : i32, i32, i32
  }
  func.func @transform_6(%arg0: i32, %arg1: i32) -> (i32, i32, i32) {
    %c0_i32 = arith.constant 0 : i32
    %c0_i32_0 = arith.constant 0 : i32
    return %arg0, %c0_i32, %arg1 : i32, i32, i32
  }
}

module attributes {stable_mosaic.version = 11 : i64} {
  func.func @_danet_attn_kernel(%arg0: i32, %arg1: i32, %arg2: memref<1x16x256xf32, #tpu.memory_space<vmem>>, %arg3: memref<2x16xbf16, #tpu.memory_space<vmem>>, %arg4: memref<2x1xf32, #tpu.memory_space<vmem>>, %arg5: memref<2x16xbf16, #tpu.memory_space<vmem>>, %arg6: memref<2x1xf32, #tpu.memory_space<vmem>>, %arg7: memref<16x16xbf16, #tpu.memory_space<vmem>>, %arg8: memref<16x1xf32, #tpu.memory_space<vmem>>, %arg9: memref<16x16xbf16, #tpu.memory_space<vmem>>, %arg10: memref<16x1xf32, #tpu.memory_space<vmem>>, %arg11: memref<1x16x32xf32, #tpu.memory_space<vmem>>, %arg12: memref<1x16x32xf32, #tpu.memory_space<vmem>>, %arg13: memref<1x16x128xf32, #tpu.memory_space<vmem>>) attributes {dimension_semantics = [#tpu.dimension_semantics<parallel>, #tpu.dimension_semantics<parallel>], iteration_bounds = array<i64: 2, 2>, scalar_prefetch = 0 : i64, scratch_operands = 0 : i64, tpu.core_type = #tpu.core_type<tc>, window_params = [{transform_indices = @transform_0, window_bounds = array<i64: 1, 16, 256>}, {pipeline_mode = #tpu.pipeline_mode<synchronous>, transform_indices = @transform_1, window_bounds = array<i64: 2, 16>}, {pipeline_mode = #tpu.pipeline_mode<synchronous>, transform_indices = @transform_2, window_bounds = array<i64: 2, 1>}, {pipeline_mode = #tpu.pipeline_mode<synchronous>, transform_indices = @transform_3, window_bounds = array<i64: 2, 16>}, {pipeline_mode = #tpu.pipeline_mode<synchronous>, transform_indices = @transform_4, window_bounds = array<i64: 2, 1>}, {pipeline_mode = #tpu.pipeline_mode<synchronous>, transform_indices = @transform_5, window_bounds = array<i64: 16, 16>}, {pipeline_mode = #tpu.pipeline_mode<synchronous>, transform_indices = @transform_6, window_bounds = array<i64: 16, 1>}, {pipeline_mode = #tpu.pipeline_mode<synchronous>, transform_indices = @transform_7, window_bounds = array<i64: 16, 16>}, {pipeline_mode = #tpu.pipeline_mode<synchronous>, transform_indices = @transform_8, window_bounds = array<i64: 16, 1>}, {transform_indices = @transform_9, window_bounds = array<i64: 1, 16, 32>}, {transform_indices = @transform_10, window_bounds = array<i64: 1, 16, 32>}, {transform_indices = @transform_11, window_bounds = array<i64: 1, 16, 128>}]} {
    %c128_i32 = arith.constant 128 : i32
    %0 = arith.muli %arg1, %c128_i32 : i32
    %1 = tpu.assume_multiple %0, 128 : i32
    %c0 = arith.constant 0 : index
    %c0_0 = arith.constant 0 : index
    %c0_1 = arith.constant 0 : index
    %2 = vector.load %arg2[%c0, %c0_0, %c0_1] : memref<1x16x256xf32, #tpu.memory_space<vmem>>, vector<1x16x256xf32>
    %3 = vector.shape_cast %2 : vector<1x16x256xf32> to vector<16x256xf32>
    %4 = arith.truncf %3 : vector<16x256xf32> to vector<16x256xbf16>
    %c0_2 = arith.constant 0 : index
    %c0_3 = arith.constant 0 : index
    %5 = arith.index_cast %1 : i32 to index
    %6 = vector.load %arg2[%c0_2, %c0_3, %5] : memref<1x16x256xf32, #tpu.memory_space<vmem>>, vector<1x16x128xf32>
    %7 = vector.shape_cast %6 : vector<1x16x128xf32> to vector<16x128xf32>
    %8 = arith.truncf %7 : vector<16x128xf32> to vector<16x128xbf16>
    %c0_4 = arith.constant 0 : index
    %c0_5 = arith.constant 0 : index
    %9 = vector.load %arg5[%c0_4, %c0_5] : memref<2x16xbf16, #tpu.memory_space<vmem>>, vector<2x16xbf16>
    %cst = arith.constant dense<0.000000e+00> : vector<2x256xf32>
    %10 = tpu.matmul %9, %4, %cst {dimension_numbers = #tpu.dot_dimension_numbers<[1], [0], [0], [1], [0, 0, 1, 1], [], []>} : vector<2x16xbf16>, vector<16x256xbf16>, vector<2x256xf32> -> vector<2x256xf32>
    %c0_6 = arith.constant 0 : index
    %c0_7 = arith.constant 0 : index
    %11 = vector.load %arg6[%c0_6, %c0_7] : memref<2x1xf32, #tpu.memory_space<vmem>>, vector<2x1xf32>
    %12 = vector.broadcast %11 : vector<2x1xf32> to vector<2x256xf32>
    %13 = arith.addf %10, %12 : vector<2x256xf32>
    %14 = arith.truncf %13 : vector<2x256xf32> to vector<2x256xbf16>
    %c0_8 = arith.constant 0 : index
    %c0_9 = arith.constant 0 : index
    %15 = vector.load %arg7[%c0_8, %c0_9] : memref<16x16xbf16, #tpu.memory_space<vmem>>, vector<16x16xbf16>
    %cst_10 = arith.constant dense<0.000000e+00> : vector<16x256xf32>
    %16 = tpu.matmul %15, %4, %cst_10 {dimension_numbers = #tpu.dot_dimension_numbers<[1], [0], [0], [1], [0, 0, 1, 1], [], []>} : vector<16x16xbf16>, vector<16x256xbf16>, vector<16x256xf32> -> vector<16x256xf32>
    %c0_11 = arith.constant 0 : index
    %c0_12 = arith.constant 0 : index
    %17 = vector.load %arg8[%c0_11, %c0_12] : memref<16x1xf32, #tpu.memory_space<vmem>>, vector<16x1xf32>
    %18 = vector.broadcast %17 : vector<16x1xf32> to vector<16x256xf32>
    %19 = arith.addf %16, %18 : vector<16x256xf32>
    %20 = arith.truncf %19 : vector<16x256xf32> to vector<16x256xbf16>
    %c0_13 = arith.constant 0 : index
    %c0_14 = arith.constant 0 : index
    %21 = vector.load %arg3[%c0_13, %c0_14] : memref<2x16xbf16, #tpu.memory_space<vmem>>, vector<2x16xbf16>
    %cst_15 = arith.constant dense<0.000000e+00> : vector<2x128xf32>
    %22 = tpu.matmul %21, %8, %cst_15 {dimension_numbers = #tpu.dot_dimension_numbers<[1], [0], [0], [1], [0, 0, 1, 1], [], []>} : vector<2x16xbf16>, vector<16x128xbf16>, vector<2x128xf32> -> vector<2x128xf32>
    %c0_16 = arith.constant 0 : index
    %c0_17 = arith.constant 0 : index
    %23 = vector.load %arg4[%c0_16, %c0_17] : memref<2x1xf32, #tpu.memory_space<vmem>>, vector<2x1xf32>
    %24 = vector.broadcast %23 : vector<2x1xf32> to vector<2x128xf32>
    %25 = arith.addf %22, %24 : vector<2x128xf32>
    %26 = arith.truncf %25 : vector<2x128xf32> to vector<2x128xbf16>
    %c0_18 = arith.constant 0 : index
    %c0_19 = arith.constant 0 : index
    %27 = vector.load %arg9[%c0_18, %c0_19] : memref<16x16xbf16, #tpu.memory_space<vmem>>, vector<16x16xbf16>
    %cst_20 = arith.constant dense<0.000000e+00> : vector<16x128xf32>
    %28 = tpu.matmul %27, %8, %cst_20 {dimension_numbers = #tpu.dot_dimension_numbers<[1], [0], [0], [1], [0, 0, 1, 1], [], []>} : vector<16x16xbf16>, vector<16x128xbf16>, vector<16x128xf32> -> vector<16x128xf32>
    %c0_21 = arith.constant 0 : index
    %c0_22 = arith.constant 0 : index
    %29 = vector.load %arg10[%c0_21, %c0_22] : memref<16x1xf32, #tpu.memory_space<vmem>>, vector<16x1xf32>
    %30 = vector.broadcast %29 : vector<16x1xf32> to vector<16x128xf32>
    %31 = arith.addf %28, %30 : vector<16x128xf32>
    %32 = arith.truncf %31 : vector<16x128xf32> to vector<16x128xbf16>
    %cst_23 = arith.constant dense<0.000000e+00> : vector<128x256xf32>
    %33 = tpu.matmul %26, %14, %cst_23 {dimension_numbers = #tpu.dot_dimension_numbers<[0], [0], [1], [1], [0, 1, 1, 1], [], []>} : vector<2x128xbf16>, vector<2x256xbf16>, vector<128x256xf32> -> vector<128x256xf32>
    %cst_24 = arith.constant dense<0xFF800000> : vector<128xf32>
    %34 = vector.multi_reduction <maximumf>, %33, %cst_24 [1] : vector<128x256xf32> to vector<128xf32>
    %35 = vector.shape_cast %34 : vector<128xf32> to vector<128x1xf32>
    %36 = vector.broadcast %35 : vector<128x1xf32> to vector<128x256xf32>
    %37 = arith.subf %33, %36 : vector<128x256xf32>
    %38 = math.exp %37 : vector<128x256xf32>
    %cst_25 = arith.constant dense<0.000000e+00> : vector<128xf32>
    %39 = vector.multi_reduction <add>, %38, %cst_25 [1] : vector<128x256xf32> to vector<128xf32>
    %40 = vector.shape_cast %39 : vector<128xf32> to vector<128x1xf32>
    %41 = arith.truncf %38 : vector<128x256xf32> to vector<128x256xbf16>
    %cst_26 = arith.constant dense<0.000000e+00> : vector<16x128xf32>
    %42 = tpu.matmul %20, %41, %cst_26 {dimension_numbers = #tpu.dot_dimension_numbers<[1], [1], [0], [0], [0, 0, 1, 0], [], []>} : vector<16x256xbf16>, vector<128x256xbf16>, vector<16x128xf32> -> vector<16x128xf32>
    %43 = tpu.reciprocal %40 {approx = true} : vector<128x1xf32> -> vector<128x1xf32>
    %44 = tpu.transpose %43, [1, 0] : vector<128x1xf32> -> vector<1x128xf32>
    %45 = vector.broadcast %44 : vector<1x128xf32> to vector<16x128xf32>
    %46 = arith.mulf %42, %45 : vector<16x128xf32>
    %c0_27 = arith.constant 0 : index
    %c0_28 = arith.constant 0 : index
    %c0_29 = arith.constant 0 : index
    %47 = vector.load %arg11[%c0_27, %c0_28, %c0_29] : memref<1x16x32xf32, #tpu.memory_space<vmem>>, vector<1x16x32xf32>
    %48 = vector.shape_cast %47 : vector<1x16x32xf32> to vector<16x32xf32>
    %49 = arith.truncf %48 : vector<16x32xf32> to vector<16x32xbf16>
    %c0_30 = arith.constant 0 : index
    %c0_31 = arith.constant 0 : index
    %c0_32 = arith.constant 0 : index
    %50 = vector.load %arg12[%c0_30, %c0_31, %c0_32] : memref<1x16x32xf32, #tpu.memory_space<vmem>>, vector<1x16x32xf32>
    %51 = vector.shape_cast %50 : vector<1x16x32xf32> to vector<16x32xf32>
    %52 = arith.truncf %51 : vector<16x32xf32> to vector<16x32xbf16>
    %cst_33 = arith.constant dense<0.000000e+00> : vector<16x16xf32>
    %53 = tpu.matmul %49, %52, %cst_33 {dimension_numbers = #tpu.dot_dimension_numbers<[1], [1], [0], [0], [0, 0, 1, 0], [], []>} : vector<16x32xbf16>, vector<16x32xbf16>, vector<16x16xf32> -> vector<16x16xf32>
    %cst_34 = arith.constant dense<0xFF800000> : vector<16xf32>
    %54 = vector.multi_reduction <maximumf>, %53, %cst_34 [1] : vector<16x16xf32> to vector<16xf32>
    %55 = vector.shape_cast %54 : vector<16xf32> to vector<16x1xf32>
    %56 = vector.broadcast %55 : vector<16x1xf32> to vector<16x16xf32>
    %57 = arith.subf %56, %53 : vector<16x16xf32>
    %cst_35 = arith.constant dense<0xFF800000> : vector<16xf32>
    %58 = vector.multi_reduction <maximumf>, %57, %cst_35 [1] : vector<16x16xf32> to vector<16xf32>
    %59 = vector.shape_cast %58 : vector<16xf32> to vector<16x1xf32>
    %60 = vector.broadcast %59 : vector<16x1xf32> to vector<16x16xf32>
    %61 = arith.subf %57, %60 : vector<16x16xf32>
    %62 = math.exp %61 : vector<16x16xf32>
    %cst_36 = arith.constant dense<0.000000e+00> : vector<16xf32>
    %63 = vector.multi_reduction <add>, %62, %cst_36 [1] : vector<16x16xf32> to vector<16xf32>
    %64 = vector.shape_cast %63 : vector<16xf32> to vector<16x1xf32>
    %65 = arith.truncf %62 : vector<16x16xf32> to vector<16x16xbf16>
    %cst_37 = arith.constant dense<0.000000e+00> : vector<16x128xf32>
    %66 = tpu.matmul %65, %32, %cst_37 {dimension_numbers = #tpu.dot_dimension_numbers<[1], [0], [0], [1], [0, 0, 1, 1], [], []>} : vector<16x16xbf16>, vector<16x128xbf16>, vector<16x128xf32> -> vector<16x128xf32>
    %67 = tpu.reciprocal %64 {approx = true} : vector<16x1xf32> -> vector<16x1xf32>
    %68 = vector.broadcast %67 : vector<16x1xf32> to vector<16x128xf32>
    %69 = arith.mulf %66, %68 : vector<16x128xf32>
    %70 = arith.addf %46, %69 : vector<16x128xf32>
    %cst_38 = arith.constant 2.000000e+00 : f32
    %71 = vector.broadcast %cst_38 : f32 to vector<16x128xf32>
    %72 = arith.mulf %71, %7 : vector<16x128xf32>
    %73 = arith.addf %70, %72 : vector<16x128xf32>
    %c0_39 = arith.constant 0 : index
    %c0_40 = arith.constant 0 : index
    %c0_41 = arith.constant 0 : index
    %74 = vector.load %arg13[%c0_39, %c0_40, %c0_41] : memref<1x16x128xf32, #tpu.memory_space<vmem>>, vector<1x16x128xf32>
    %75 = vector.shape_cast %74 : vector<1x16x128xf32> to vector<16x128xf32>
    %76 = vector.shape_cast %73 : vector<16x128xf32> to vector<1x16x128xf32>
    tpu.vector_store %arg13[%c0_39, %c0_40, %c0_41], %76 {strides = array<i32>} : memref<1x16x128xf32, #tpu.memory_space<vmem>>, vector<1x16x128xf32>,
    return
  }
  func.func @transform_0(%arg0: i32, %arg1: i32) -> (i32, i32, i32) {
    %c0_i32 = arith.constant 0 : i32
    %c0_i32_0 = arith.constant 0 : i32
    %c0_i32_1 = arith.constant 0 : i32
    return %arg0, %c0_i32, %c0_i32_0 : i32, i32, i32
  }
  func.func @transform_1(%arg0: i32, %arg1: i32) -> (i32, i32) {
    %c0_i32 = arith.constant 0 : i32
    %c0_i32_0 = arith.constant 0 : i32
    %c0_i32_1 = arith.constant 0 : i32
    return %c0_i32, %c0_i32_0 : i32, i32
  }
  func.func @transform_2(%arg0: i32, %arg1: i32) -> (i32, i32) {
    %c0_i32 = arith.constant 0 : i32
    %c0_i32_0 = arith.constant 0 : i32
    %c0_i32_1 = arith.constant 0 : i32
    return %c0_i32, %c0_i32_0 : i32, i32
  }
  func.func @transform_3(%arg0: i32, %arg1: i32) -> (i32, i32) {
    %c0_i32 = arith.constant 0 : i32
    %c0_i32_0 = arith.constant 0 : i32
    %c0_i32_1 = arith.constant 0 : i32
    return %c0_i32, %c0_i32_0 : i32, i32
  }
  func.func @transform_4(%arg0: i32, %arg1: i32) -> (i32, i32) {
    %c0_i32 = arith.constant 0 : i32
    %c0_i32_0 = arith.constant 0 : i32
    %c0_i32_1 = arith.constant 0 : i32
    return %c0_i32, %c0_i32_0 : i32, i32
  }
  func.func @transform_5(%arg0: i32, %arg1: i32) -> (i32, i32) {
    %c0_i32 = arith.constant 0 : i32
    %c0_i32_0 = arith.constant 0 : i32
    %c0_i32_1 = arith.constant 0 : i32
    return %c0_i32, %c0_i32_0 : i32, i32
  }
  func.func @transform_6(%arg0: i32, %arg1: i32) -> (i32, i32) {
    %c0_i32 = arith.constant 0 : i32
    %c0_i32_0 = arith.constant 0 : i32
    %c0_i32_1 = arith.constant 0 : i32
    return %c0_i32, %c0_i32_0 : i32, i32
  }
  func.func @transform_7(%arg0: i32, %arg1: i32) -> (i32, i32) {
    %c0_i32 = arith.constant 0 : i32
    %c0_i32_0 = arith.constant 0 : i32
    %c0_i32_1 = arith.constant 0 : i32
    return %c0_i32, %c0_i32_0 : i32, i32
  }
  func.func @transform_8(%arg0: i32, %arg1: i32) -> (i32, i32) {
    %c0_i32 = arith.constant 0 : i32
    %c0_i32_0 = arith.constant 0 : i32
    %c0_i32_1 = arith.constant 0 : i32
    return %c0_i32, %c0_i32_0 : i32, i32
  }
  func.func @transform_9(%arg0: i32, %arg1: i32) -> (i32, i32, i32) {
    %c0_i32 = arith.constant 0 : i32
    %c0_i32_0 = arith.constant 0 : i32
    %c0_i32_1 = arith.constant 0 : i32
    return %arg0, %c0_i32, %c0_i32_0 : i32, i32, i32
  }
  func.func @transform_10(%arg0: i32, %arg1: i32) -> (i32, i32, i32) {
    %c0_i32 = arith.constant 0 : i32
    %c0_i32_0 = arith.constant 0 : i32
    %c0_i32_1 = arith.constant 0 : i32
    return %arg0, %c0_i32, %c0_i32_0 : i32, i32, i32
  }
  func.func @transform_11(%arg0: i32, %arg1: i32) -> (i32, i32, i32) {
    %c0_i32 = arith.constant 0 : i32
    %c0_i32_0 = arith.constant 0 : i32
    return %arg0, %c0_i32, %arg1 : i32, i32, i32
  }
}

</mosaic_0001>

<bundles_post_ra>
// kernel: danet_forward.2
= control target key start
LH: loop header
LB: loop body
LE: loop exit
PB: predicated region body
PF: predicated region fallthrough
CT: control target
= control target key end

     0   :  { %s765_s21 = smov 0   ;;  %s767_s22 = smov 0   ;;  %s871_s0 = inlined_call_operand.vmem [shape: f32[2,16,256], index: 0, kind: input, shape index: {}]   ;;  %s872_s1 = inlined_call_operand.vmem [shape: bf16[2,16], index: 1, kind: input, shape index: {}]   ;;  %s873_s2 = inlined_call_operand.vmem [shape: f32[2,1], index: 2, kind: input, shape index: {}]   ;;  %s874_s3 = inlined_call_operand.vmem [shape: bf16[2,16], index: 3, kind: input, shape index: {}]   ;;  %s875_s4 = inlined_call_operand.vmem [shape: f32[2,1], index: 4, kind: input, shape index: {}]   ;;  %s876_s5 = inlined_call_operand.vmem [shape: f32[2,2,256], index: 5, kind: output, shape index: {0}]   ;;  %s877_s6 = inlined_call_operand.vmem [shape: f32[2,2,256], index: 6, kind: output, shape index: {1}]  }
   0x1   :  { %s769_s23 = smov 0   ;;  %s771_s24 = smov 0  }
   0x2   :  { %s773_s25 = smov 0   ;;  %s775_s26 = smov 0  }
   0x3   :  { %s777_s27 = smov 0  }
   0x4 LB: > { %s26_s28 = sadd.s32 1, %s717_s25  ;;  %s29_s29 = sadd.s32 1, %s721_s26  ;;  %s725_s27 = sphi %s777_s27, %s17_s27   ;;  %s721_s26 = sphi %s775_s26, %s883_s26   ;;  %s717_s25 = sphi %s773_s25, %s882_s25   ;;  %s713_s24 = sphi %s771_s24, %s881_s24   ;;  %s709_s23 = sphi %s769_s23, %s880_s23   ;;  %s705_s22 = sphi %s767_s22, %s879_s22   ;;  %s701_s21 = sphi %s765_s21, %s878_s21  }
   0x5   : > { %p27_p0 = scmp.ge.s32.totalorder %s26_s28, 2  ;;  %p45_p1 = scmp.ne.s32.totalorder %s705_s22, %s701_s21 }
   0x6   : > { %p46_p2 = scmp.eq.s32.totalorder %s725_s27, 0  ;;  %s38_s9 = sadd.s32 1, %s705_s22 }
   0x7   : > { %s885_s28 = smov (%p27_p0, %s26_s28), 0  ;;  %s887_s29 = smov (!%p27_p0, %s29_s29), %s721_s26 }
   0x8   : > { %p47_p3 = por %p46_p2, %p45_p1  ;;  %p31_p4 = scmp.ge.s32.totalorder %s887_s29, 2 }
   0x9   : > { %s34_s30 = ssub.s32 %s717_s25, %s885_s28  ;;  %p581_p6 = scmp.ge.s32.totalorder %s725_s27, 4 }
   0xa   : > { %s889_s29 = smov (%p31_p4, %s887_s29), 0 }
   0xb   : > { %s33_s7 = ssub.s32 %s721_s26, %s889_s29  ;;  %223 = sbr.rel (%p581_p6) target bundleno = 23 (0x17), region = 32 }
   0xc   : > { %s35_s8 = sor.u32 %s34_s30, %s33_s7 }
   0xd   : > { %p36_p5 = scmp.eq.s32.totalorder %s35_s8, 0 }
   0xf   : > { %s816_s10 = scalar_select %p36_p5, %s705_s22, %s38_s9  }
  0x10   : > { %226 = sbr.rel (!%p47_p3) target bundleno = 23 (0x17), region = 36  ;;  %s228_s11 = sand.u32 (%p47_p3), 1, %s705_s22  }
  0x11   : > { %s583_s12 = sshll.u32 (%p47_p3), %s721_s26, 2  ;;  %s582_s13 = sshll.u32 (%p47_p3), %s228_s11, 4 }
  0x12   : > { %s232_s14 = sadd.s32 (%p47_p3), %s717_s25, %s583_s12  ;;  %s230_s19 = scalar_lea.vmem (%p47_p3), [#allocation2], %s582_s13 }
  0x13   : > { %s584_s15 = sshll.u32 (%p47_p3), %s232_s14, 3 }
  0x14   : > { %s234_s18 = scalar_lea.vmem (%p47_p3), %s871_s0, %s584_s15 }
  0x15   : > { %v265_v0 = vld [vmem:[%s234_s18] sm:$0xff]  ;;  %v267_v1 = vld [vmem:[%s234_s18 + $0x10] sm:$0xff] }
  0x16   : > { %266 = vst [vmem:[%s230_s19] sm:$0xff] %v265_v0  ;;  %268 = vst [vmem:[%s230_s19 + $0x8] sm:$0xff] %v267_v1 }
  0x17 PF: > { %p585_p7 = scmp.ge.s32.totalorder %s725_s27, 1  ;;  %p273_p8 = scmp.lt.s32.totalorder %s725_s27, 5 }
  0x19   : > { %p274_p9 = pnand %p585_p7, %p273_p8 }
  0x1a   : > { %s280_s20 = sand.u32 (!%p274_p9), 1, %s701_s21   ;;  %p320_p10 = scmp.lt.s32.totalorder (!%p274_p9), %s713_s24, 1 }
  0x1b   : > { %277 = sbr.rel (%p274_p9) target bundleno = 239 (0xef), region = 74  ;;  %s586_s30 = sshll.u32 (!%p274_p9), %s280_s20, 4 }
  0x1c   : > { %s282_s9 = scalar_lea.vmem (!%p274_p9), [#allocation2], %s586_s30  ;;  %p322_p11 = scmp.lt.s32.totalorder (!%p274_p9), %s709_s23, 1 }
  0x20   : > { %v727_v2 = vmov 0.0   ;;  %v341_v3 = vld [vmem:[%s873_s2] sm:$0x3]  ;;  %vm728_vm0 = vmmov 0   ;;  %v338_v5 = vld [vmem:[%s282_s9 + $0x8] sm:$0xff]  ;;  %v729_v6 = vmov 0  }
  0x21   : > { %599 = vmatprep.subr.bf16.mxu0 %v727_v2  ;;  %605 = vmatprep.subr.bf16.mxu1 %v727_v2  ;;  %v337_v4 = vld [vmem:[%s282_s9] sm:$0xff]  ;;  %vm347_vm1 = vcmask 130048   ;;  %s891_s24 = smov (!%p320_p10, %s713_s24), 1  ;;  %s893_s23 = smov (!%p322_p11, %s709_s23), 1 }
  0x22   : > { %601 = vmatprep.mubr.msk.bf16.mxu0 %vm728_vm0, %v727_v2  ;;  %607 = vmatprep.mubr.msk.bf16.mxu1 %vm728_vm0, %v727_v2  ;;  %v339_v7 = vpack.c.bf16 %v338_v5, %v337_v4  ;;  %v393_v8 = vld [vmem:[%s875_s4] sm:$0x3]  ;;  %s587_s16 = sshll.u32 %s891_s24, 1 }
  0x23   : > { %670 = vset.pattern.permute.xlu0 %v729_v6  ;;  %v340_v9 = vld [vmem:[%s872_s1] sm:$0x1]  ;;  %s325_s17 = sadd.s32 %s587_s16, %s893_s23 }
  0x24   : > { %344 = vperm.xlu0 %670, %v341_v3   ;;  %600 = vmatpush3.bf16.msra.mxu0 %v339_v7  ;;  %v392_v10 = vld [vmem:[%s874_s3] sm:$0x1]  ;;  %s588_s18 = sshll.u32 %s325_s17, 1 }
  0x25   : > { %606 = vmatpush3.bf16.msra.mxu1 %v339_v7  ;;  %s327_s30 = scalar_lea.vmem %s876_s5, %s588_s18  ;;  %s335_s9 = scalar_lea.vmem %s877_s6, %s588_s18 }
  0x27   : > { %602 = vmatmul.mubr.msk.bf16.vlgmr.msra.gmra.mxu0 %vm347_vm1, %v340_v9 }
  0x28   : > { %396 = vperm.xlu0 %670, %v393_v8   ;;  %608 = vmatmul.mubr.msk.bf16.vlgmr.msra.gmra.mxu1 %vm347_vm1, %v392_v10 }
  0x9f   : > { %v345_v11 = vpop.permute.xlu0 %344 }
  0xa3   : > { %v397_v12 = vpop.permute.xlu0 %396 }
  0xe7   : > { %v385_v13 = vpop.f32.mrf.mxu0 }
  0xe8   : > { %v436_v14 = vpop.f32.mrf.mxu1  ;;  %v386_v15 = vadd.f32 %v385_v13, %v345_v11 }
  0xe9   : > { %v437_v16 = vadd.f32 %v436_v14, %v397_v12  ;;  %v603_v17 = vpop.f32.mrf.mxu0 }
  0xea   : > { %v609_v18 = vpop.f32.mrf.mxu1  ;;  %391 = vst [vmem:[%s327_s30] sm:$0x3] %v386_v15 }
  0xeb   : > { %442 = vst [vmem:[%s335_s9] sm:$0x3] %v437_v16  ;;  %v388_v19 = vpop.f32.mrf.mxu0 }
  0xec   : > { %v439_v20 = vpop.f32.mrf.mxu1 }
  0xed   : > { %v604_v21 = vpop.f32.mrf.mxu0 }
  0xee   : > { %v610_v22 = vpop.f32.mrf.mxu1 }
  0xef PF: > { %s17_s27 = sadd.s32 1, %s725_s27   ;;  %s878_s21 = smov %s705_s22 }
  0xf0   : > { %p14_p12 = scmp.ge.s32.totalorder %s17_s27, 6   ;;  %s879_s22 = smov %s816_s10 }
  0xf1   : > { %s880_s23 = smov %s717_s25  ;;  %s881_s24 = smov %s721_s26 }
  0xf2   : > { %s882_s25 = smov %s885_s28  ;;  %s883_s26 = smov %s889_s29 }
  0xf3   :  { %16 = sbr.rel (!%p14_p12) target bundleno = 4 (0x4), region = 125 }

// kernel: danet_forward.3
= control target key start
LH: loop header
LB: loop body
LE: loop exit
PB: predicated region body
PF: predicated region fallthrough
CT: control target
= control target key end

     0   :  { %s1783_s17 = smov 0   ;;  %s1785_s18 = smov 0   ;;  %s2195_s0 = inlined_call_operand.vmem [shape: f32[2,16,256], index: 0, kind: input, shape index: {}]   ;;  %s2196_s1 = inlined_call_operand.vmem [shape: bf16[2,16], index: 1, kind: input, shape index: {}]   ;;  %s2197_s2 = inlined_call_operand.vmem [shape: f32[2,1], index: 2, kind: input, shape index: {}]   ;;  %s2198_s3 = inlined_call_operand.vmem [shape: bf16[2,16], index: 3, kind: input, shape index: {}]   ;;  %s2199_s4 = inlined_call_operand.vmem [shape: f32[2,1], index: 4, kind: input, shape index: {}]   ;;  %s2200_s5 = inlined_call_operand.vmem [shape: bf16[16,16], index: 5, kind: input, shape index: {}]   ;;  %s2201_s6 = inlined_call_operand.vmem [shape: f32[16,1], index: 6, kind: input, shape index: {}]   ;;  %s2202_s7 = inlined_call_operand.vmem [shape: bf16[16,16], index: 7, kind: input, shape index: {}]   ;;  %s2203_s8 = inlined_call_operand.vmem [shape: f32[16,1], index: 8, kind: input, shape index: {}]   ;;  %s2204_s9 = inlined_call_operand.vmem [shape: f32[2,16,32], index: 9, kind: input, shape index: {}]   ;;  %s2205_s10 = inlined_call_operand.vmem [shape: f32[2,16,32], index: 10, kind: input, shape index: {}]   ;;  %s2206_s11 = inlined_call_operand.vmem [shape: f32[2,16,256], index: 11, kind: output, shape index: {}]  }
   0x1   :  { %s1787_s19 = smov 0   ;;  %s1789_s20 = smov 0  }
   0x2   :  { %s1791_s21 = smov 0   ;;  %s1793_s22 = smov 0  }
   0x3   :  { %s1795_s23 = smov 0  }
   0x4 LB: > { %2211 = sst [smem:[#allocation3_spill]] %s1710_s21  ;;  %s30_s24 = sadd.s32 1, %s1710_s21  ;;  %s1718_s23 = sphi %s1795_s23, %s21_s23   ;;  %s1714_s22 = sphi %s1793_s22, %s2219_s22   ;;  %s1710_s21 = sphi %s1791_s21, %s2218_s21   ;;  %s1706_s20 = sphi %s1789_s20, %s2217_s20   ;;  %s1702_s19 = sphi %s1787_s19, %s2216_s19   ;;  %s1698_s18 = sphi %s1785_s18, %s2221_s18   ;;  %s1694_s17 = sphi %s1783_s17, %s2220_s17  }
   0x5   : > { %2212 = sst [smem:[#allocation4_spill]] %s1714_s22  ;;  %p31_p0 = scmp.ge.s32.totalorder %s30_s24, 2 }
   0x6   : > { %s33_s25 = sadd.s32 1, %s1714_s22  ;;  %s1425_s26 = sadd.s32 4294967295, %s1718_s23  }
   0x7   : > { %p298_p1 = scmp.ne.s32.totalorder %s1698_s18, %s1694_s17  ;;  %s2223_s24 = smov (%p31_p0, %s30_s24), 0 }
   0x8   : > { %2213 = sst [smem:[#allocation5_spill]] %s2223_s24  ;;  %s2225_s25 = smov (!%p31_p0, %s33_s25), %s1714_s22 }
   0x9   : > { %s284_s27 = ssub.s32 %s1710_s21, %s2223_s24  ;;  %p299_p2 = scmp.eq.s32.totalorder %s1425_s26, 3 }
   0xa   : > { %p35_p3 = scmp.ge.s32.totalorder %s2225_s25, 2  ;;  %p1429_p4 = scmp.ge.s32.totalorder %s1718_s23, 1 }
   0xb   : > { %p1829_p5 = por %p299_p2, %p298_p1  ;;  %p371_p6 = scmp.lt.s32.totalorder %s1718_s23, 5 }
   0xc   : > { %s2227_s25 = smov (%p35_p3, %s2225_s25), 0  ;;  %s288_s12 = sadd.s32 1, %s1698_s18 }
   0xd   : > { %2215 = sst [smem:[#allocation6_spill]] %s2227_s25  ;;  %p372_p7 = pnand %p1429_p4, %p371_p6 }
   0xe   : > { %s283_s29 = ssub.s32 %s1714_s22, %s2227_s25  ;;  %p420_p9 = scmp.lt.s32.totalorder (!%p372_p7), %s1706_s20, 1 }
   0xf   : > { %s285_s30 = sor.u32 %s284_s27, %s283_s29  ;;  %375 = sbr.rel (%p372_p7) target bundleno = 1109 (0x455), region = 64 }
  0x10   : > { %p286_p8 = scmp.eq.s32.totalorder %s285_s30, 0  ;;  %s1437_s14 = sshll.u32 (!%p372_p7), %s1702_s19, 7 }
  0x11   : > { %s443_s30 = sshra.s32 (!%p372_p7), %s1437_s14, 7 }
  0x12   : > { %s1840_s13 = scalar_select %p286_p8, %s1698_s18, %s288_s12  }
  0x13   : > { %s1438_s25 = sshll.u32 (!%p372_p7), %s443_s30, 3 }
  0x14   : > { %v1720_v0 = vmov 0   ;;  %v572_v1 = vld [vmem:[%s2197_s2] sm:$0x3]  ;;  %s1850_s26 = scalar_select %p420_p9, %s1706_s20, 1  ;;  %vm457_vm0 = vcmask 130048   ;;  %v1721_v13 = vmov 0.0  }
  0x15   : > { %493 = vmatprep.mubr.bf16.mxu0 %v1720_v0  ;;  %1555 = vset.pattern.permute.xlu0 %v1720_v0  ;;  %v451_v2 = vld [vmem:[%s2199_s4] sm:$0x3]  ;;  %vm1722_vm1 = vmmov 0   ;;  %vm727_vm2 = vcmask 1040384   ;;  %vm1156_vm3 = vcmask 261120   ;;  %vm702_vm4 = vcmask 15360  }
  0x16   : > { %575 = vperm.xlu0 %1555, %v572_v1   ;;  %558 = vmatprep.mubr.bf16.mxu1 %v1720_v0  ;;  %s1461_s12 = sshll.u32 %s1850_s26, 5  ;;  %v450_v11 = vld [vmem:[%s2198_s3] sm:$0x1] }
  0x17   : > { %s424_s21 = scalar_lea.vmem %s2195_s0, %s1461_s12  ;;  %v571_v14 = vld [vmem:[%s2196_s1] sm:$0x1] }
  0x18   : > { %v438_v3 = vld [vmem:[%s424_s21 + $0x8] sm:$0xff]  ;;  %v440_v4 = vld [vmem:[%s424_s21 + $0x18] sm:$0xff]  ;;  %v437_v5 = vld [vmem:[%s424_s21] sm:$0xff]  ;;  %s1860_s15 = scalar_lea.vmem %s424_s21, %s1438_s25  ;;  %s1462_s25 = sshll.u32 %s1850_s26, 4 }
  0x19   : > { %v442_v6 = vpack.c.bf16 %v440_v4, %v438_v3  ;;  %v439_v7 = vld [vmem:[%s424_s21 + $0x10] sm:$0xff]  ;;  %v1863_v8 = vld [vmem:[%s1860_s15] sm:$0xff]  ;;  %s434_s29 = scalar_lea.vmem %s2205_s10, %s1462_s25  ;;  %s429_s14 = scalar_lea.vmem %s2204_s9, %s1462_s25 }
  0x1a   : > { %454 = vperm.xlu0 %1555, %v451_v2   ;;  %v448_v9 = vld [vmem:[%s1860_s15 + $0x10] sm:$0xff]  ;;  %v441_v10 = vpack.c.bf16 %v439_v7, %v437_v5  ;;  %v1153_v32 = vld [vmem:[%s434_s29] sm:$0xff]  ;;  %v1154_v33 = vld [vmem:[%s434_s29 + $0x8] sm:$0xff]  ;;  %s417_s21 = sand.u32 1, %s1694_s17   ;;  %s1457_s17 = sshll.u32 (%p1829_p5), %s1706_s20, 2 }
  0x1b   : > { %475 = vmatprep.subr.bf16.mxu0 %v442_v6  ;;  %540 = vmatprep.subr.bf16.mxu1 %v442_v6  ;;  %v1870_v12 = vpack.c.bf16 %v448_v9, %v1863_v8  ;;  %v1155_v34 = vpack.c.bf16 %v1154_v33, %v1153_v32  ;;  %v1150_v44 = vld [vmem:[%s429_s14] sm:$0xff]  ;;  %v1151_v45 = vld [vmem:[%s429_s14 + $0x8] sm:$0xff]  ;;  %s1430_s26 = sshll.u32 %s417_s21, 4  ;;  %s1295_s25 = sadd.s32 (%p1829_p5), %s1702_s19, %s1457_s17 }
  0x1c   : > { %476 = vmatpush1.bf16.msra.mxu0 %v441_v10  ;;  %541 = vmatpush1.bf16.msra.mxu1 %v441_v10  ;;  %v1152_v46 = vpack.c.bf16 %v1151_v45, %v1150_v44  ;;  %v1557_v47 = vld [vmem:[%s2200_s5] sm:$0xff]   ;;  %s419_s24 = scalar_lea.vmem [#allocation2], %s1430_s26  ;;  %s1458_s16 = sshll.u32 (%p1829_p5), %s1295_s25, 3 }
  0x1d   : > { %1472 = vmatprep.subr.bf16.mxu0 %v1721_v13  ;;  %1478 = vmatprep.subr.bf16.mxu1 %v1721_v13  ;;  %v1161_v35 = vsel %vm1156_vm3, %v1155_v34, 0  ;;  %v1558_v48 = vld [vmem:[%s2202_s7] sm:$0xff]  }
  0x1f   : > { %1439 = vmatmul.mubr.msk.bf16.vlgmr.msra.gmra.mxu0 %vm457_vm0, %v450_v11  ;;  %1441 = vmatmul.mubr.msk.bf16.vlgmr.msra.gmra.mxu1 %vm457_vm0, %v1557_v47 }
  0x20   : > { %1473 = vmatpush3.bf16.msra.mxu0 %v1870_v12  ;;  %1474 = vmatprep.mubr.msk.bf16.mxu0 %vm1722_vm1, %v1721_v13 }
  0x21   : > { %1479 = vmatpush3.bf16.msra.mxu1 %v1870_v12  ;;  %1480 = vmatprep.mubr.msk.bf16.mxu1 %vm1722_vm1, %v1721_v13 }
  0x27   : > { %1475 = vmatmul.mubr.msk.bf16.vlgmr.msra.gmra.mxu0 %vm457_vm0, %v571_v14  ;;  %1481 = vmatmul.mubr.msk.bf16.vlgmr.msra.gmra.mxu1 %vm457_vm0, %v1558_v48 }
  0x28   : > { %766 = vmatprep.mubr.bf16.mxu0 %v1720_v0 }
  0x91   : > { %v576_v15 = vpop.permute.xlu0 %575 }
  0x95   : > { %v455_v16 = vpop.permute.xlu0 %454 }
  0xdf   : > { %v495_v17 = vpop.f32.mrf.mxu0 }
  0xe0   : > { %v496_v18 = vadd.f32 %v495_v17, %v455_v16 }
  0xe1   : > { %v497_v19 = vpop.f32.mrf.mxu0 }
  0xe2   : > { %v502_v20 = vpack.c.bf16 %v496_v18, %v496_v18  ;;  %v498_v21 = vadd.f32 %v497_v19, %v455_v16 }
  0xe3   : > { %v499_v22 = vpop.f32.mrf.mxu0 }
  0xe4   : > { %v503_v23 = vpack.c.bf16 %v498_v21, %v498_v21  ;;  %v729_v25 = vsel %vm727_vm2, %v502_v20, 0 }
  0xe5   : > { %v500_v24 = vpop.f32.mrf.mxu0 }
  0xe6   : > { %1445 = vmatprep.subr.msk.bf16.mxu0 %vm727_vm2, %v503_v23 }
  0xe7   : > { %v615_v26 = vpop.f32.mrf.mxu0  ;;  %749 = vmatpush1.bf16.msra.mxu0 %v729_v25 }
  0xe8   : > { %v616_v27 = vadd.f32 %v615_v26, %v576_v15  ;;  %1484 = vmatprep.subr.bf16.mxu0 %v1721_v13 }
  0xe9   : > { %v1476_v28 = vpop.f32.mrf.mxu0 }
  0xea   : > { %v621_v29 = vpack.c.bf16 %v616_v27, %v616_v27 }
  0xeb   : > { %v618_v30 = vpop.f32.mrf.mxu0 }
  0xec   : > { %686 = vxpose.xlu1.c.b16.start.end [1/1] (short) %v621_v29, 128 }
  0xed   : > { %v1477_v31 = vpop.f32.mrf.mxu0 }
  0xf0   : > { %1556 = vset.pattern.permute.xlu1 %v1720_v0 }
 0x14e   : > { %v694_v36 = vpop.trf.xlu1 }
 0x14f   : > { %1446 = vmatmul.mubr.msk.bf16.vlgmr.msra.gmra.mxu0 %vm702_vm4, %v694_v36 }
 0x150   : > { %1485 = vmatpush3.bf16.xpose.msra.mxu0 %v1161_v35  ;;  %776 = vmatprep.mubr.bf16.mxu0 %v1720_v0 }
 0x152   : > { %v695_v37 = vpop.trf.xlu1 }
 0x156   : > { %v696_v38 = vpop.trf.xlu1 }
 0x157   : > { %1447 = vmatmul.mubr.msk.bf16.gmra.mxu0 %vm702_vm4, %v695_v37 }
 0x158   : > { %786 = vmatprep.mubr.bf16.mxu0 %v1720_v0 }
 0x15a   : > { %v697_v39 = vpop.trf.xlu1 }
 0x15e   : > { %v698_v40 = vpop.trf.xlu1 }
 0x15f   : > { %1448 = vmatmul.mubr.msk.bf16.gmra.mxu0 %vm702_vm4, %v696_v38 }
 0x160   : > { %796 = vmatprep.mubr.bf16.mxu0 %v1720_v0 }
 0x162   : > { %v699_v41 = vpop.trf.xlu1 }
 0x166   : > { %v700_v42 = vpop.trf.xlu1 }
 0x167   : > { %1449 = vmatmul.mubr.msk.bf16.gmra.mxu0 %vm702_vm4, %v697_v39 }
 0x168   : > { %806 = vmatprep.mubr.bf16.mxu0 %v1720_v0 }
 0x16a   : > { %v701_v43 = vpop.trf.xlu1 }
 0x16f   : > { %1450 = vmatmul.mubr.msk.bf16.gmra.mxu0 %vm702_vm4, %v698_v40 }
 0x170   : > { %816 = vmatprep.mubr.bf16.mxu0 %v1720_v0 }
 0x177   : > { %1451 = vmatmul.mubr.msk.bf16.gmra.mxu0 %vm702_vm4, %v699_v41  ;;  %v506_v41 = vld [vmem:[%s2201_s6] sm:$0xff] }
 0x178   : > { %826 = vmatprep.mubr.bf16.mxu0 %v1720_v0 }
 0x17f   : > { %1452 = vmatmul.mubr.msk.bf16.gmra.mxu0 %vm702_vm4, %v700_v42 }
 0x180   : > { %836 = vmatprep.mubr.bf16.mxu0 %v1720_v0 }
 0x187   : > { %1453 = vmatmul.mubr.msk.bf16.gmra.mxu0 %vm702_vm4, %v701_v43 }
 0x188   : > { %1486 = vmatprep.mubr.msk.bf16.mxu0 %vm1722_vm1, %v1721_v13 }
 0x18f   : > { %1487 = vmatmul.mubr.msk.bf16.vlgmr.msra.gmra.mxu0 %vm1156_vm3, %v1152_v46 }
 0x20f   : > { %v1926_v49 = vpop.f32.mrf.mxu0 }
 0x211   : > { %v1928_v50 = vpop.f32.mrf.mxu0 }
 0x212   : > { %v847_v37 = vmax.f32 %v1926_v49, %v1928_v50 }
 0x213   : > { %v1930_v51 = vpop.f32.mrf.mxu0 }
 0x215   : > { %v1932_v52 = vpop.f32.mrf.mxu0 }
 0x216   : > { %v850_v40 = vmax.f32 %v1930_v51, %v1932_v52 }
 0x217   : > { %v1934_v53 = vpop.f32.mrf.mxu0 }
 0x219   : > { %v1936_v54 = vpop.f32.mrf.mxu0 }
 0x21a   : > { %v853_v35 = vmax.f32 %v1934_v53, %v1936_v54 }
 0x21b   : > { %v1938_v55 = vpop.f32.mrf.mxu0 }
 0x21d   : > { %v1940_v56 = vpop.f32.mrf.mxu0 }
 0x21e   : > { %v856_v39 = vmax.f32 %v1938_v55, %v1940_v56 }
 0x21f   : > { %v1942_v57 = vpop.f32.mrf.mxu0 }
 0x221   : > { %v1944_v58 = vpop.f32.mrf.mxu0 }
 0x222   : > { %v859_v33 = vmax.f32 %v1942_v57, %v1944_v58 }
 0x223   : > { %v1946_v59 = vpop.f32.mrf.mxu0 }
 0x225   : > { %v1948_v60 = vpop.f32.mrf.mxu0 }
 0x226   : > { %v862_v38 = vmax.f32 %v1946_v59, %v1948_v60 }
 0x227   : > { %v1950_v61 = vpop.f32.mrf.mxu0 }
 0x229   : > { %v1952_v62 = vpop.f32.mrf.mxu0 }
 0x22a   : > { %v865_v31 = vmax.f32 %v1950_v61, %v1952_v62 }
 0x22b   : > { %v1954_v63 = vpop.f32.mrf.mxu0 }
 0x22d   : > { %v1956_v0 = vpop.f32.mrf.mxu0 }
 0x22e   : > { %v868_v36 = vmax.f32 %v1954_v63, %v1956_v0 }
 0x22f   : > { %v1958_v1 = vpop.f32.mrf.mxu0 }
 0x231   : > { %v1960_v2 = vpop.f32.mrf.mxu0 }
 0x232   : > { %v871_v29 = vmax.f32 %v1958_v1, %v1960_v2 }
 0x233   : > { %v1962_v3 = vpop.f32.mrf.mxu0 }
 0x235   : > { %v1964_v4 = vpop.f32.mrf.mxu0 }
 0x236   : > { %v874_v34 = vmax.f32 %v1962_v3, %v1964_v4 }
 0x237   : > { %v1966_v5 = vpop.f32.mrf.mxu0 }
 0x239   : > { %v1968_v6 = vpop.f32.mrf.mxu0 }
 0x23a   : > { %v877_v27 = vmax.f32 %v1966_v5, %v1968_v6 }
 0x23b   : > { %v1970_v7 = vpop.f32.mrf.mxu0 }
 0x23d   : > { %v1972_v9 = vpop.f32.mrf.mxu0 }
 0x23e   : > { %v880_v32 = vmax.f32 %v1970_v7, %v1972_v9 }
 0x23f   : > { %v1974_v10 = vpop.f32.mrf.mxu0 }
 0x241   : > { %v1976_v11 = vpop.f32.mrf.mxu0 }
 0x242   : > { %v883_v24 = vmax.f32 %v1974_v10, %v1976_v11 }
 0x243   : > { %v1978_v12 = vpop.f32.mrf.mxu0 }
 0x245   : > { %v1980_v14 = vpop.f32.mrf.mxu0 }
 0x246   : > { %v886_v30 = vmax.f32 %v1978_v12, %v1980_v14 }
 0x247   : > { %v838_v15 = vpop.f32.mrf.mxu0 }
 0x249   : > { %v840_v16 = vpop.f32.mrf.mxu0 }
 0x24a   : > { %v889_v17 = vmax.f32 %v838_v15, %v840_v16 }
 0x24b   : > { %v1982_v18 = vpop.f32.mrf.mxu0 }
 0x24c   : > { %890 = vmax.xlane.f32.xlu0 %v889_v17 }
 0x24d   : > { %v1984_v19 = vpop.f32.mrf.mxu0 }
 0x24e   : > { %v892_v28 = vmax.f32 %v1982_v18, %v1984_v19 }
 0x24f   : > { %v1197_v20 = vpop.f32.mrf.mxu0 }
 0x250   : > { %v1204_v21 = vsel %vm457_vm0, %v1197_v20, -inf }
 0x251   : > { %1205 = vmax.xlane.f32.xlu1 %v1204_v21  ;;  %v1488_v22 = vpop.f32.mrf.mxu0 }
 0x253   : > { %v1200_v23 = vpop.f32.mrf.mxu0 }
 0x254   : > { %v1207_v25 = vsel %vm457_vm0, %v1200_v23, -inf }
 0x255   : > { %884 = vmax.xlane.f32.xlu1 %v883_v24  ;;  %1208 = vmax.xlane.f32.xlu0 %v1207_v25  ;;  %v1489_v26 = vpop.f32.mrf.mxu0 }
 0x259   : > { %878 = vmax.xlane.f32.xlu1 %v877_v27  ;;  %893 = vmax.xlane.f32.xlu0 %v892_v28 }
 0x25d   : > { %872 = vmax.xlane.f32.xlu1 %v871_v29  ;;  %887 = vmax.xlane.f32.xlu0 %v886_v30 }
 0x261   : > { %866 = vmax.xlane.f32.xlu1 %v865_v31  ;;  %881 = vmax.xlane.f32.xlu0 %v880_v32 }
 0x265   : > { %860 = vmax.xlane.f32.xlu1 %v859_v33  ;;  %875 = vmax.xlane.f32.xlu0 %v874_v34 }
 0x269   : > { %854 = vmax.xlane.f32.xlu1 %v853_v35  ;;  %869 = vmax.xlane.f32.xlu0 %v868_v36 }
 0x26d   : > { %848 = vmax.xlane.f32.xlu1 %v847_v37  ;;  %863 = vmax.xlane.f32.xlu0 %v862_v38 }
 0x271   : > { %857 = vmax.xlane.f32.xlu0 %v856_v39 }
 0x275   : > { %851 = vmax.xlane.f32.xlu0 %v850_v40 }
 0x27e   : > { %510 = vperm.xlu1 %1556, %v506_v41  }
 0x2d5   : > { %v891_v42 = vpop.xlane.xlu0 %890 }
 0x2d6   : > { %v923_v43 = vsub.f32 %v838_v15, %v891_v42  ;;  %v924_v44 = vsub.f32 %v840_v16, %v891_v42  ;;  %v2029_v15 = vpop.f32.mrf.mxu1  ;;  %v624_v42 = vld [vmem:[%s2203_s8] sm:$0xff] }
 0x2d8   : > { %v983_v45 = vmul.f32 1.442695, %v923_v43  ;;  %v985_v46 = vmul.f32 1.442695, %v924_v44  ;;  %v2034_v30 = vpop.f32.mrf.mxu1 }
 0x2da   : > { %1559 = vpow2.f32 %v983_v45  ;;  %v1206_v47 = vpop.xlane.xlu1 %1205  ;;  %v2041_v36 = vpop.f32.mrf.mxu1 }
 0x2db   : > { %1561 = vpow2.f32 %v985_v46  ;;  %v2021_v48 = vsub.f32 %v1206_v47, %v1197_v20 }
 0x2dd   : > { %v1212_v17 = vsel %vm457_vm0, %v2021_v48, -inf }
 0x2de   : > { %1213 = vmax.xlane.f32.xlu1 %v1212_v17  ;;  %v885_v21 = vpop.xlane.xlu1 %884  ;;  %v1209_v22 = vpop.xlane.xlu0 %1208  ;;  %v625_v17 = vld [vmem:[%s2203_s8 + $0x8] sm:$0xff] }
 0x2df   : > { %v2025_v24 = vsub.f32 %v1209_v22, %v1200_v23  ;;  %v920_v28 = vsub.f32 %v1976_v11, %v885_v21  ;;  %v919_v40 = vsub.f32 %v1974_v10, %v885_v21 }
 0x2e1   : > { %v1215_v25 = vsel %vm457_vm0, %v2025_v24, -inf  ;;  %v977_v37 = vmul.f32 1.442695, %v920_v28  ;;  %v975_v47 = vmul.f32 1.442695, %v919_v40 }
 0x2e2   : > { %v879_v16 = vpop.xlane.xlu1 %878  ;;  %1216 = vmax.xlane.f32.xlu0 %v1215_v25  ;;  %v894_v26 = vpop.xlane.xlu0 %893 }
 0x2e3   : > { %v925_v27 = vsub.f32 %v1982_v18, %v894_v26  ;;  %v926_v20 = vsub.f32 %v1984_v19, %v894_v26  ;;  %v916_v41 = vsub.f32 %v1968_v6, %v879_v16  ;;  %v915_v10 = vsub.f32 %v1966_v5, %v879_v16 }
 0x2e5   : > { %v987_v29 = vmul.f32 1.442695, %v925_v27  ;;  %v989_v31 = vmul.f32 1.442695, %v926_v20  ;;  %v967_v5 = vmul.f32 1.442695, %v915_v10 }
 0x2e6   : > { %v873_v23 = vpop.xlane.xlu1 %872  ;;  %v888_v32 = vpop.xlane.xlu0 %887 }
 0x2e7   : > { %v2036_v33 = vpop.eup %1559  ;;  %v922_v35 = vsub.f32 %v1980_v14, %v888_v32  ;;  %1563 = vpow2.f32 %v987_v29  ;;  %v921_v18 = vsub.f32 %v1978_v12, %v888_v32  ;;  %v2056_v12 = vpop.f32.mrf.mxu1  ;;  %v911_v16 = vsub.f32 %v1958_v1, %v873_v23 }
 0x2e8   : > { %v2038_v34 = vpop.eup %1561  ;;  %1565 = vpow2.f32 %v989_v31  ;;  %v912_v28 = vsub.f32 %v1960_v2, %v873_v23 }
 0x2e9   : > { %v981_v11 = vmul.f32 1.442695, %v922_v35  ;;  %v2048_v39 = vadd.f32 %v2038_v34, %v2036_v33  ;;  %1567 = vpow2.f32 %v977_v37  ;;  %v979_v43 = vmul.f32 1.442695, %v921_v18  ;;  %v2061_v6 = vpop.f32.mrf.mxu1 }
 0x2ea   : > { %v2044_v19 = vpop.xlane.xlu1 %866  ;;  %v882_v38 = vpop.xlane.xlu0 %881  ;;  %v961_v23 = vmul.f32 1.442695, %v912_v28 }
 0x2eb   : > { %v918_v14 = vsub.f32 %v1972_v9, %v882_v38  ;;  %1569 = vpow2.f32 %v981_v11  ;;  %v969_v9 = vmul.f32 1.442695, %v916_v41  ;;  %v917_v21 = vsub.f32 %v1970_v7, %v882_v38  ;;  %v1482_v22 = vpop.f32.mrf.mxu1 }
 0x2ec   : > { %1571 = vpow2.f32 %v979_v43  ;;  %v908_v7 = vsub.f32 %v1952_v62, %v2044_v19  ;;  %v959_v11 = vmul.f32 1.442695, %v911_v16 }
 0x2ed   : > { %v973_v44 = vmul.f32 1.442695, %v918_v14  ;;  %v2073_v20 = vpop.f32.mrf.mxu1  ;;  %v971_v29 = vmul.f32 1.442695, %v917_v21 }
 0x2ee   : > { %v2058_v45 = vpop.xlane.xlu1 %860  ;;  %v876_v46 = vpop.xlane.xlu0 %875  ;;  %v953_v41 = vmul.f32 1.442695, %v908_v7 }
 0x2ef   : > { %628 = vperm.xlu1 %1556, %v624_v42   ;;  %1573 = vpow2.f32 %v973_v44  ;;  %v914_v25 = vsub.f32 %v1964_v4, %v876_v46  ;;  %v507_v4 = vld [vmem:[%s2201_s6 + $0x8] sm:$0xff]  ;;  %v1483_v31 = vpop.f32.mrf.mxu1  ;;  %v903_v35 = vsub.f32 %v1942_v57, %v2058_v45  ;;  %v913_v62 = vsub.f32 %v1962_v3, %v876_v46 }
 0x2f0   : > { %1575 = vpow2.f32 %v975_v47 }
 0x2f1   : > { %1577 = vpow2.f32 %v969_v9  ;;  %v965_v1 = vmul.f32 1.442695, %v914_v25  ;;  %v943_v42 = vmul.f32 1.442695, %v903_v35 }
 0x2f2   : > { %v2068_v26 = vpop.xlane.xlu1 %854  ;;  %v2070_v27 = vpop.xlane.xlu0 %869  ;;  %1579 = vpow2.f32 %v967_v5 }
 0x2f3   : > { %633 = vperm.xlu1 %1556, %v625_v17   ;;  %1581 = vpow2.f32 %v971_v29  ;;  %v910_v57 = vsub.f32 %v1956_v0, %v2070_v27 }
 0x2f4   : > { %v1564_v32 = vpop.eup %1563  ;;  %1583 = vpow2.f32 %v965_v1 }
 0x2f5   : > { %v1566_v18 = vpop.eup %1565  ;;  %v1053_v40 = vpack.c.bf16 %v1564_v32, %v2036_v33  ;;  %1585 = vpow2.f32 %v959_v11  ;;  %v957_v46 = vmul.f32 1.442695, %v910_v57 }
 0x2f6   : > { %v2083_v37 = vpop.xlane.xlu0 %863  ;;  %v849_v2 = vpop.xlane.xlu1 %848  ;;  %v1054_v38 = vpack.c.bf16 %v1566_v18, %v2038_v34  ;;  %v2093_v47 = vadd.f32 %v1566_v18, %v1564_v32  ;;  %1587 = vpow2.f32 %v961_v23  ;;  %v963_v34 = vmul.f32 1.442695, %v913_v62 }
 0x2f7   : > { %v2090_v14 = vpop.eup %1567  ;;  %v895_v43 = vsub.f32 %v1926_v49, %v849_v2  ;;  %v896_v33 = vsub.f32 %v1928_v50, %v849_v2  ;;  %1589 = vpow2.f32 %v953_v41  ;;  %v904_v49 = vsub.f32 %v1944_v58, %v2058_v45 }
 0x2f8   : > { %515 = vperm.xlu0 %1555, %v507_v4   ;;  %1055 = vmatprep.subr.bf16.mxu1 %v1054_v38  ;;  %v2095_v3 = vpop.eup %1569  ;;  %1591 = vpow2.f32 %v943_v42  ;;  %v899_v50 = vsub.f32 %v1934_v53, %v2068_v26  ;;  %v900_v58 = vsub.f32 %v1936_v54, %v2068_v26  ;;  %v909_v45 = vsub.f32 %v1954_v63, %v2070_v27 }
 0x2f9   : > { %1056 = vmatpush1.bf16.xpose.msra.mxu1 %v1053_v40  ;;  %v1052_v0 = vpack.c.bf16 %v2095_v3, %v2090_v14  ;;  %v2100_v10 = vpop.eup %1571  ;;  %v927_v9 = vmul.f32 1.442695, %v895_v43  ;;  %v929_v22 = vmul.f32 1.442695, %v896_v33  ;;  %1593 = vpow2.f32 %v963_v34 }
 0x2fa   : > { %v858_v44 = vpop.xlane.xlu0 %857  ;;  %1595 = vpow2.f32 %v957_v46  ;;  %v907_v54 = vsub.f32 %v1950_v61, %v2044_v19  ;;  %v935_v63 = vmul.f32 1.442695, %v899_v50  ;;  %v937_v27 = vmul.f32 1.442695, %v900_v58 }
 0x2fb   : > { %1057 = vmatprep.subr.bf16.mxu1 %v1052_v0  ;;  %1597 = vpow2.f32 %v927_v9  ;;  %v901_v31 = vsub.f32 %v1938_v55, %v858_v44  ;;  %v955_v32 = vmul.f32 1.442695, %v909_v45  ;;  %v902_v35 = vsub.f32 %v1940_v56, %v858_v44 }
 0x2fc   : > { %v2104_v21 = vpop.eup %1573  ;;  %1599 = vpow2.f32 %v929_v22  ;;  %v951_v61 = vmul.f32 1.442695, %v907_v54  ;;  %v905_v55 = vsub.f32 %v1946_v59, %v2083_v37 }
 0x2fd   : > { %v2110_v16 = vpop.eup %1575  ;;  %v939_v11 = vmul.f32 1.442695, %v901_v31  ;;  %v941_v23 = vmul.f32 1.442695, %v902_v35 }
 0x2fe   : > { %v852_v17 = vpop.xlane.xlu0 %851  ;;  %v2116_v28 = vpop.eup %1577  ;;  %v1051_v53 = vpack.c.bf16 %v2100_v10, %v2110_v16  ;;  %v947_v57 = vmul.f32 1.442695, %v905_v55  ;;  %v1027_v55 = vadd.f32 %v2110_v16, %v2090_v14 }
 0x2ff   : > { %v897_v25 = vsub.f32 %v1930_v51, %v852_v17  ;;  %v898_v5 = vsub.f32 %v1932_v52, %v852_v17  ;;  %v945_v51 = vmul.f32 1.442695, %v904_v49  ;;  %v906_v52 = vsub.f32 %v1948_v60, %v2083_v37  ;;  %v2126_v26 = vpop.eup %1579  ;;  %v511_v14 = vpop.permute.xlu1 %510 }
 0x300   : > { %v1050_v4 = vpack.c.bf16 %v2104_v21, %v2116_v28  ;;  %v2130_v60 = vpop.eup %1581  ;;  %v1021_v35 = vadd.f32 %v2126_v26, %v2116_v28 }
 0x301   : > { %v931_v7 = vmul.f32 1.442695, %v897_v25  ;;  %v933_v29 = vmul.f32 1.442695, %v898_v5  ;;  %1058 = vmatpush1.bf16.xpose.msra.mxu1 %v1051_v53  ;;  %v949_v1 = vmul.f32 1.442695, %v906_v52  ;;  %v2132_v18 = vpop.eup %1583  ;;  %v1049_v56 = vpack.c.bf16 %v2130_v60, %v2126_v26 }
 0x302   : > { %1059 = vmatprep.subr.bf16.mxu1 %v1050_v4  ;;  %v1586_v19 = vpop.eup %1585  ;;  %v1030_v26 = vadd.f32 %v2100_v10, %v2095_v3  ;;  %v561_v3 = vadd.f32 %v2029_v15, %v511_v14 }
 0x303   : > { %1601 = vpow2.f32 %v931_v7  ;;  %v1588_v2 = vpop.eup %1587 }
 0x304   : > { %1603 = vpow2.f32 %v933_v29  ;;  %v1590_v62 = vpop.eup %1589  ;;  %v1048_v38 = vpack.c.bf16 %v2132_v18, %v1588_v2  ;;  %v1015_v31 = vadd.f32 %v1588_v2, %v1586_v19 }
 0x305   : > { %1605 = vpow2.f32 %v945_v51  ;;  %v1592_v40 = vpop.eup %1591 }
 0x306   : > { %1607 = vpow2.f32 %v935_v63  ;;  %v1594_v41 = vpop.eup %1593 }
 0x307   : > { %1609 = vpow2.f32 %v937_v27  ;;  %v1596_v42 = vpop.eup %1595  ;;  %v1047_v37 = vpack.c.bf16 %v1594_v41, %v1586_v19  ;;  %v1024_v19 = vadd.f32 %v2130_v60, %v2104_v21 }
 0x308   : > { %1611 = vpow2.f32 %v955_v32  ;;  %v1598_v43 = vpop.eup %1597  ;;  %v1046_v34 = vpack.c.bf16 %v1596_v42, %v1590_v62 }
 0x309   : > { %1613 = vpow2.f32 %v949_v1  ;;  %1060 = vmatpush1.bf16.xpose.msra.mxu1 %v1049_v56  ;;  %v1600_v44 = vpop.eup %1599 }
 0x30a   : > { %1615 = vpow2.f32 %v951_v61  ;;  %1061 = vmatprep.subr.bf16.mxu1 %v1048_v38  ;;  %v991_v9 = vadd.f32 %v1600_v44, %v1598_v43  ;;  %v1018_v61 = vadd.f32 %v1594_v41, %v2132_v18 }
 0x30b   : > { %1617 = vpow2.f32 %v939_v11 }
 0x30c   : > { %1619 = vpow2.f32 %v941_v23 }
 0x30d   : > { %1621 = vpow2.f32 %v947_v57 }
 0x310   : > { %v1602_v59 = vpop.eup %1601 }
 0x311   : > { %v1604_v33 = vpop.eup %1603  ;;  %1062 = vmatpush1.bf16.xpose.msra.mxu1 %v1047_v37  ;;  %v1039_v28 = vpack.c.bf16 %v1602_v59, %v1598_v43 }
 0x312   : > { %v1606_v0 = vpop.eup %1605  ;;  %1063 = vmatprep.subr.bf16.mxu1 %v1046_v34  ;;  %v994_v17 = vadd.f32 %v1604_v33, %v1602_v59  ;;  %v1040_v11 = vpack.c.bf16 %v1604_v33, %v1600_v44 }
 0x313   : > { %v1608_v46 = vpop.eup %1607  ;;  %v1003_v53 = vadd.f32 %v1606_v0, %v1592_v40 }
 0x314   : > { %v1610_v49 = vpop.eup %1609 }
 0x315   : > { %v1612_v50 = vpop.eup %1611  ;;  %v997_v45 = vadd.f32 %v1610_v49, %v1608_v46 }
 0x316   : > { %v1614_v22 = vpop.eup %1613  ;;  %v1012_v32 = vadd.f32 %v1612_v50, %v1596_v42 }
 0x317   : > { %992 = vadd.xlane.f32.xlu0 %v991_v9  ;;  %995 = vadd.xlane.f32.xlu1 %v994_v17  ;;  %v1616_v25 = vpop.eup %1615  ;;  %v1044_v29 = vpack.c.bf16 %v1614_v22, %v1606_v0 }
 0x318   : > { %v1618_v5 = vpop.eup %1617  ;;  %v1045_v58 = vpack.c.bf16 %v1612_v50, %v1616_v25  ;;  %v1009_v4 = vadd.f32 %v1616_v25, %v1590_v62  ;;  %v563_v62 = vadd.f32 %v2034_v30, %v511_v14 }
 0x319   : > { %v1620_v7 = vpop.eup %1619  ;;  %v1041_v1 = vpack.c.bf16 %v1618_v5, %v1608_v46 }
 0x31a   : > { %1064 = vmatpush1.bf16.xpose.msra.mxu1 %v1045_v58  ;;  %v1000_v51 = vadd.f32 %v1620_v7, %v1618_v5  ;;  %v1622_v52 = vpop.eup %1621  ;;  %v1042_v27 = vpack.c.bf16 %v1620_v7, %v1610_v49 }
 0x31b   : > { %998 = vadd.xlane.f32.xlu0 %v997_v45  ;;  %1065 = vmatprep.subr.bf16.mxu1 %v1044_v29  ;;  %v1043_v54 = vpack.c.bf16 %v1622_v52, %v1592_v40  ;;  %v1006_v63 = vadd.f32 %v1622_v52, %v1614_v22 }
 0x31c   : > { %1004 = vadd.xlane.f32.xlu1 %v1003_v53 }
 0x31f   : > { %1001 = vadd.xlane.f32.xlu0 %v1000_v51 }
 0x320   : > { %1010 = vadd.xlane.f32.xlu1 %v1009_v4 }
 0x322   : > { %1066 = vmatpush1.bf16.xpose.msra.mxu1 %v1043_v54 }
 0x323   : > { %1007 = vadd.xlane.f32.xlu0 %v1006_v63  ;;  %1067 = vmatprep.subr.bf16.mxu1 %v1042_v27 }
 0x324   : > { %1016 = vadd.xlane.f32.xlu1 %v1015_v31 }
 0x327   : > { %1013 = vadd.xlane.f32.xlu0 %v1012_v32 }
 0x328   : > { %1022 = vadd.xlane.f32.xlu1 %v1021_v35 }
 0x32a   : > { %1068 = vmatpush1.bf16.xpose.msra.mxu1 %v1041_v1 }
 0x32b   : > { %1019 = vadd.xlane.f32.xlu0 %v1018_v61  ;;  %1069 = vmatprep.subr.bf16.mxu1 %v1040_v11  ;;  %v1144_v61 = vlaneseq }
 0x32c   : > { %1028 = vadd.xlane.f32.xlu1 %v1027_v55 }
 0x32d   : > { %v1145_v55 = vshrl.u32 %v1144_v61, 7 }
 0x32f   : > { %1025 = vadd.xlane.f32.xlu0 %v1024_v19 }
 0x330   : > { %1034 = vadd.xlane.f32.xlu1 %v2048_v39 }
 0x332   : > { %1070 = vmatpush1.bf16.xpose.msra.mxu1 %v1039_v28  ;;  %v1146_v28 = vsub.s32 0, %v1145_v55 }
 0x333   : > { %1031 = vadd.xlane.f32.xlu0 %v1030_v26  ;;  %1490 = vmatprep.subr.bf16.mxu1 %v1721_v13 }
 0x337   : > { %1037 = vadd.xlane.f32.xlu0 %v2093_v47 }
 0x367   : > { %v1214_v16 = vpop.xlane.xlu1 %1213 }
 0x368   : > { %v1218_v18 = vsub.f32 %v2021_v48, %v1214_v16 }
 0x36a   : > { %v1220_v2 = vmul.f32 1.442695, %v1218_v18 }
 0x36b   : > { %v629_v23 = vpop.permute.xlu1 %628  ;;  %v1217_v21 = vpop.xlane.xlu0 %1216 }
 0x36c   : > { %1623 = vpow2.f32 %v1220_v2  ;;  %v1219_v39 = vsub.f32 %v2025_v24, %v1217_v21  ;;  %v679_v40 = vadd.f32 %v2061_v6, %v629_v23 }
 0x36e   : > { %v1222_v60 = vmul.f32 1.442695, %v1219_v39 }
 0x36f   : > { %v634_v56 = vpop.permute.xlu1 %633 }
 0x370   : > { %1625 = vpow2.f32 %v1222_v60  ;;  %v682_v47 = vadd.f32 %v2073_v20, %v634_v56  ;;  %v1281_v56 = vmul.f32 2.0, %v1863_v8 }
 0x372   : > { %v685_v42 = vpack.c.bf16 %v682_v47, %v679_v40 }
 0x373   : > { %v516_v10 = vpop.permute.xlu0 %515 }
 0x374   : > { %v565_v38 = vadd.f32 %v2041_v36, %v516_v10  ;;  %v567_v48 = vadd.f32 %v2056_v12, %v516_v10 }
 0x376   : > { %v569_v41 = vpack.c.bf16 %v565_v38, %v561_v3  ;;  %v570_v57 = vpack.c.bf16 %v567_v48, %v563_v62 }
 0x378   : > { %1087 = vmatprep.mubr.bf16.mxu1 %v570_v57 }
 0x379   : > { %v1624_v24 = vpop.eup %1623  ;;  %1088 = vmatmul.mubr.bf16.vlgmr.msra.gmra.mxu1 %v569_v41  ;;  %v1663_v41 = vld [vmem:[%s1860_s15 + $0x10] sm:$0xff]  ;;  %s1297_s15 = scalar_lea.vmem (%p1829_p5), %s2206_s11, %s1458_s16 }
 0x37a   : > { %1491 = vmatpush3.bf16.msra.mxu1 %v685_v42  ;;  %v1224_v15 = vsel %vm457_vm0, %v1624_v24, 0.0  ;;  %1492 = vmatprep.mubr.msk.bf16.mxu1 %vm1722_vm1, %v1721_v13  ;;  %v1282_v57 = vmul.f32 2.0, %v1663_v41 }
 0x37b   : > { %1225 = vadd.xlane.f32.xlu1 %v1224_v15 }
 0x37d   : > { %v1626_v30 = vpop.eup %1625 }
 0x37e   : > { %v1227_v36 = vsel %vm457_vm0, %v1626_v30, 0.0  ;;  %v1230_v20 = vpack.c.bf16 %v1626_v30, %v1624_v24 }
 0x37f   : > { %1228 = vadd.xlane.f32.xlu0 %v1227_v36 }
 0x381   : > { %1493 = vmatmul.mubr.msk.bf16.vlgmr.msra.gmra.mxu1 %vm457_vm0, %v1230_v20 }
 0x3a0   : > { %v993_v12 = vpop.xlane.xlu0 %992  ;;  %v996_v6 = vpop.xlane.xlu1 %995 }
 0x3a1   : > { %1627 = vrcp.f32 %v993_v12 }
 0x3a2   : > { %1629 = vrcp.f32 %v996_v6 }
 0x3a4   : > { %v999_v43 = vpop.xlane.xlu0 %998 }
 0x3a5   : > { %1631 = vrcp.f32 %v999_v43  ;;  %v1005_v37 = vpop.xlane.xlu1 %1004 }
 0x3a8   : > { %v1002_v44 = vpop.xlane.xlu0 %1001 }
 0x3a9   : > { %1633 = vrcp.f32 %v1002_v44  ;;  %v1011_v0 = vpop.xlane.xlu1 %1010 }
 0x3aa   : > { %1635 = vrcp.f32 %v1005_v37 }
 0x3ac   : > { %v1008_v33 = vpop.xlane.xlu0 %1007 }
 0x3ad   : > { %1637 = vrcp.f32 %v1008_v33  ;;  %v1017_v17 = vpop.xlane.xlu1 %1016 }
 0x3ae   : > { %v1628_v59 = vpop.eup %1627  ;;  %1639 = vrcp.f32 %v1011_v0 }
 0x3af   : > { %1112 = vxpose.xlu1.b32.start [1/16] (narrow) %v1628_v59, 8  ;;  %v1630_v13 = vpop.eup %1629 }
 0x3b0   : > { %v1014_v49 = vpop.xlane.xlu0 %1013 }
 0x3b1   : > { %1641 = vrcp.f32 %v1014_v49  ;;  %v1023_v5 = vpop.xlane.xlu1 %1022 }
 0x3b2   : > { %v1632_v34 = vpop.eup %1631  ;;  %1643 = vrcp.f32 %v1017_v17 }
 0x3b3   : > { %1113 = vxpose.xlu1.b32.cont [2/16] (narrow) %v1630_v13, 8 }
 0x3b4   : > { %v1020_v22 = vpop.xlane.xlu0 %1019 }
 0x3b5   : > { %1645 = vrcp.f32 %v1020_v22  ;;  %v1029_v29 = vpop.xlane.xlu1 %1028 }
 0x3b6   : > { %v1634_v46 = vpop.eup %1633  ;;  %1647 = vrcp.f32 %v1023_v5 }
 0x3b7   : > { %1114 = vxpose.xlu1.b32.cont [3/16] (narrow) %v1632_v34, 8  ;;  %v1636_v9 = vpop.eup %1635 }
 0x3b8   : > { %v1026_v45 = vpop.xlane.xlu0 %1025 }
 0x3b9   : > { %1649 = vrcp.f32 %v1026_v45  ;;  %v1035_v4 = vpop.xlane.xlu1 %1034 }
 0x3ba   : > { %v1638_v50 = vpop.eup %1637  ;;  %1651 = vrcp.f32 %v1029_v29 }
 0x3bb   : > { %1115 = vxpose.xlu1.b32.cont [4/16] (narrow) %v1634_v46, 8  ;;  %v1640_v25 = vpop.eup %1639 }
 0x3bc   : > { %v1032_v51 = vpop.xlane.xlu0 %1031 }
 0x3bd   : > { %1653 = vrcp.f32 %v1032_v51 }
 0x3be   : > { %v1642_v58 = vpop.eup %1641  ;;  %1655 = vrcp.f32 %v1035_v4 }
 0x3bf   : > { %1116 = vxpose.xlu1.b32.cont [5/16] (narrow) %v1636_v9, 8  ;;  %v1644_v7 = vpop.eup %1643 }
 0x3c0   : > { %v1038_v63 = vpop.xlane.xlu0 %1037 }
 0x3c1   : > { %1657 = vrcp.f32 %v1038_v63 }
 0x3c2   : > { %v1646_v53 = vpop.eup %1645 }
 0x3c3   : > { %1117 = vxpose.xlu1.b32.cont [6/16] (narrow) %v1638_v50, 8  ;;  %v1648_v52 = vpop.eup %1647 }
 0x3c6   : > { %v1650_v54 = vpop.eup %1649 }
 0x3c7   : > { %1118 = vxpose.xlu1.b32.cont [7/16] (narrow) %v1640_v25, 8  ;;  %v1652_v27 = vpop.eup %1651 }
 0x3ca   : > { %v1654_v31 = vpop.eup %1653 }
 0x3cb   : > { %1119 = vxpose.xlu1.b32.cont [8/16] (narrow) %v1642_v58, 8  ;;  %v1656_v32 = vpop.eup %1655 }
 0x3ce   : > { %v1658_v35 = vpop.eup %1657 }
 0x3cf   : > { %1120 = vxpose.xlu1.b32.cont [9/16] (narrow) %v1644_v7, 8 }
 0x3d3   : > { %1121 = vxpose.xlu1.b32.cont [10/16] (narrow) %v1646_v53, 8 }
 0x3d7   : > { %1122 = vxpose.xlu1.b32.cont [11/16] (narrow) %v1648_v52, 8 }
 0x3db   : > { %1123 = vxpose.xlu1.b32.cont [12/16] (narrow) %v1650_v54, 8 }
 0x3df   : > { %1124 = vxpose.xlu1.b32.cont [13/16] (narrow) %v1652_v27, 8 }
 0x3e3   : > { %1125 = vxpose.xlu1.b32.cont [14/16] (narrow) %v1654_v31, 8 }
 0x3e7   : > { %1126 = vxpose.xlu1.b32.cont [15/16] (narrow) %v1656_v32, 8 }
 0x3eb   : > { %1127 = vxpose.xlu1.b32.end [16/16] (narrow) %v1658_v35, 8 }
 0x404   : > { %v1226_v1 = vpop.xlane.xlu1 %1225 }
 0x405   : > { %1659 = vrcp.f32 %v1226_v1 }
 0x408   : > { %v1229_v11 = vpop.xlane.xlu0 %1228 }
 0x409   : > { %1661 = vrcp.f32 %v1229_v11 }
 0x412   : > { %v1660_v23 = vpop.eup %1659 }
 0x416   : > { %v1662_v62 = vpop.eup %1661 }
 0x42b   : > { %v1128_v26 = vpop.trf.xlu1 }
 0x42c   : > { %v1147_v18 = vrot.slane %v1128_v26, %v1146_v28 }
 0x439   : > { %v1089_v19 = vpop.f32.mrf.mxu1 }
 0x43a   : > { %v1148_v39 = vmul.f32 %v1147_v18, %v1089_v19 }
 0x43b   : > { %v1091_v14 = vpop.f32.mrf.mxu1 }
 0x43d   : > { %v1092_v16 = vpop.f32.mrf.mxu1 }
 0x43e   : > { %v1149_v38 = vmul.f32 %v1147_v18, %v1092_v16 }
 0x43f   : > { %v1094_v2 = vpop.f32.mrf.mxu1 }
 0x441   : > { %v1268_v21 = vpop.f32.mrf.mxu1 }
 0x442   : > { %v1277_v60 = vmul.f32 %v1660_v23, %v1268_v21 }
 0x443   : > { %v1494_v3 = vpop.f32.mrf.mxu1 }
 0x444   : > { %v1279_v10 = vadd.f32 %v1277_v60, %v1148_v39 }
 0x445   : > { %v1271_v47 = vpop.f32.mrf.mxu1 }
 0x446   : > { %v1283_v48 = vadd.f32 %v1281_v56, %v1279_v10  ;;  %v1278_v40 = vmul.f32 %v1662_v62, %v1271_v47 }
 0x447   : > { %v1495_v42 = vpop.f32.mrf.mxu1 }
 0x448   : > { %1285 = vst [vmem:[%s419_s24] sm:$0xff] %v1283_v48  ;;  %v1280_v24 = vadd.f32 %v1278_v40, %v1149_v38  ;;  %1293 = sbr.rel (!%p1829_p5) target bundleno = 1109 (0x455), region = 68 }
 0x44a   : > { %v1284_v15 = vadd.f32 %v1282_v57, %v1280_v24 }
 0x44c   : > { %1286 = vst [vmem:[%s419_s24 + $0x8] sm:$0xff] %v1284_v15 }
 0x44f   : > { %v1328_v8 = vld [vmem:[%s419_s24] sm:$0xff] }
 0x450   : > { %1329 = vst [vmem:[%s1297_s15] sm:$0xff] %v1328_v8 }
 0x453   : > { %v1330_v30 = vld [vmem:[%s419_s24 + $0x8] sm:$0xff] }
 0x454   : > { %1331 = vst [vmem:[%s1297_s15 + $0x10] sm:$0xff] %v1330_v30 }
 0x455 PF: > { %s21_s23 = sadd.s32 1, %s1718_s23   ;;  %s2216_s19 = sld [smem:[#allocation3_spill]] }
 0x456   : > { %p18_p10 = scmp.ge.s32.totalorder %s21_s23, 6   ;;  %s2217_s20 = sld [smem:[#allocation4_spill]] }
 0x457   : > { %s2218_s21 = sld [smem:[#allocation5_spill]]  ;;  %s2220_s17 = smov %s1698_s18 }
 0x458   : > { %s2219_s22 = sld [smem:[#allocation6_spill]]  ;;  %s2221_s18 = smov %s1840_s13 }
 0x459   :  { %20 = sbr.rel (!%p18_p10) target bundleno = 4 (0x4), region = 139 }

</bundles_post_ra>
